<compile_context>
chip_gen: v7x
topology: tpu7x:2x2x1
jax: 0.10.0
libtpu: 0.0.40
codegen_flags: <defaults>
</compile_context>

<pallas_src>
import jax
import jax.numpy as jnp
from jax.experimental import pallas as pl
from jax.experimental.pallas import tpu as pltpu

# ----------------------------- model sizes (small) ---------------------------
V_IN = 16        # input_size (vocab)
E = 32           # embedding_size
H = 32           # hidden_size
NUM_LAYERS = 2   # num_layers
S = 8            # seq_len
B = 4            # batch
assert E == H, "stacked per-layer weight layout below assumes embedding_size == hidden_size"


# ------------------------------- kernel --------------------------------------
def encoder_kernel(x_oh_ref,        # (S*B, V_IN)   bf16  one-hot tokens, time-major flattened
                   wx0_ref,         # (V_IN, 4H)    bf16  = emb @ W_ih[0]  (fused embed + input proj)
                   wih_rest_ref,    # (L-1, H, 4H)  bf16  input->gate weights, layers 1..L-1
                   whh_ref,         # (L, H, 4H)    bf16  hidden->gate weights
                   b_ref,           # (L, 1, 4H)    f32   combined bias (b_ih + b_hh)
                   h_out_ref,       # (L, B, H)     f32
                   c_out_ref,       # (L, B, H)     f32
                   hseq_sc):        # (S*B, H)      f32   per-step hidden outputs of current layer
    # Layer-0 input-side gate contribution for ALL timesteps: one MXU push.
    xc = jnp.dot(x_oh_ref[...], wx0_ref[...],
                 preferred_element_type=jnp.float32)               # (S*B, 4H)

    for layer in range(NUM_LAYERS):
        if layer > 0:
            # Next layer's input contributions, again one MXU push over all timesteps.
            xc = jnp.dot(hseq_sc[...].astype(jnp.bfloat16),
                         wih_rest_ref[layer - 1],
                         preferred_element_type=jnp.float32)       # (S*B, 4H)
        whh_l = whh_ref[layer]                                     # (H, 4H) bf16
        b_l = b_ref[layer]                                         # (1, 4H) f32

        h = jnp.zeros((B, H), jnp.float32)
        c = jnp.zeros((B, H), jnp.float32)
        last_layer = (layer == NUM_LAYERS - 1)

        # Fully unrolled recurrence (S is small): per step only one small MXU
        # push + EUP/VPU work sits on the serial dependency chain.
        for t in range(S):
            gates = (xc[t * B:(t + 1) * B, :]
                     + jnp.dot(h.astype(jnp.bfloat16), whh_l,
                               preferred_element_type=jnp.float32)
                     + b_l)                                        # (B, 4H)
            # Activate the full 128-lane gate vector (EUP slot is otherwise idle),
            # then extract the four gates (PyTorch order: i, f, g, o).
            sig = jax.nn.sigmoid(gates)
            tnh = jnp.tanh(gates)
            i_g = sig[:, 0 * H:1 * H]
            f_g = sig[:, 1 * H:2 * H]
            g_g = tnh[:, 2 * H:3 * H]
            o_g = sig[:, 3 * H:4 * H]
            c = f_g * c + i_g * g_g
            h = o_g * jnp.tanh(c)
            if not last_layer:
                hseq_sc[t * B:(t + 1) * B, :] = h                  # feed next layer

        h_out_ref[layer] = h
        c_out_ref[layer] = c


# ------------------------------- wrapper --------------------------------------
@jax.jit
def encoder_forward(params, x_tokens):
    """x_tokens: (S, B) int32 token ids.  Returns (hidden, cell), each (L, B, H) f32."""
    # One-hot encoding so the embedding lookup becomes (and fuses into) a matmul.
    x_oh = jax.nn.one_hot(x_tokens.reshape(S * B), V_IN, dtype=jnp.bfloat16)   # (S*B, V)

    # Fuse embedding table with the layer-0 input projection: one (V, 4H) weight.
    wx0 = jnp.dot(params["emb"], params["wih"][0]).astype(jnp.bfloat16)        # (V, 4H)
    if NUM_LAYERS > 1:
        wih_rest = params["wih"][1:].astype(jnp.bfloat16)                      # (L-1, H, 4H)
    else:
        wih_rest = jnp.zeros((1, H, 4 * H), jnp.bfloat16)                      # unused dummy
    whh = params["whh"].astype(jnp.bfloat16)                                   # (L, H, 4H)
    b = params["b"]                                                            # (L, 1, 4H)

    # Single kernel invocation (no grid): everything is VMEM-resident
    # (total footprint << VMEM on v5e/v6e/v7x), outputs written once.
    hidden, cell = pl.pallas_call(
        encoder_kernel,
        out_shape=(jax.ShapeDtypeStruct((NUM_LAYERS, B, H), jnp.float32),
                   jax.ShapeDtypeStruct((NUM_LAYERS, B, H), jnp.float32)),
        scratch_shapes=[pltpu.VMEM((S * B, H), jnp.float32)],
    )(x_oh, wx0, wih_rest, whh, b)
    return hidden, cell


# ------------------------------ params / main ---------------------------------
def init_params(key):
    ks = jax.random.split(key, 1 + 3 * NUM_LAYERS)
    rnd = lambda k, shape: (0.1 * jax.random.normal(k, shape)).astype(jnp.float32)
    emb = rnd(ks[0], (V_IN, E))
    wih, whh, b = [], [], []
    for l in range(NUM_LAYERS):
        in_dim = E if l == 0 else H
        wih.append(rnd(ks[1 + 3 * l], (in_dim, 4 * H)))
        whh.append(rnd(ks[2 + 3 * l], (H, 4 * H)))
        # combined bias == b_ih + b_hh of the PyTorch LSTM cell
        b.append(rnd(ks[3 + 3 * l], (1, 4 * H)))
    return {"emb": emb,
            "wih": jnp.stack(wih),     # (L, E==H, 4H)
            "whh": jnp.stack(whh),     # (L, H, 4H)
            "b":   jnp.stack(b)}       # (L, 1, 4H)


if __name__ == "__main__":
    key = jax.random.PRNGKey(0)
    kp, kx = jax.random.split(key)

    params = init_params(kp)
    x = jax.random.randint(kx, (S, B), 0, V_IN, dtype=jnp.int32)   # (seq_len, batch) token ids

    hidden, cell = encoder_forward(params, x)
    hidden, cell = jax.block_until_ready((hidden, cell))

    assert hidden.shape == (NUM_LAYERS, B, H)
    assert cell.shape == (NUM_LAYERS, B, H)
    assert bool(jnp.all(jnp.isfinite(hidden)))
    assert bool(jnp.all(jnp.isfinite(cell)))
    print("KERNEL_OK")
</pallas_src>

<mosaic_0001>
module attributes {stable_mosaic.version = 11 : i64} {
  func.func @encoder_kernel(%arg0: memref<32x16xbf16, #tpu.memory_space<vmem>>, %arg1: memref<16x128xbf16, #tpu.memory_space<vmem>>, %arg2: memref<1x32x128xbf16, #tpu.memory_space<vmem>>, %arg3: memref<2x32x128xbf16, #tpu.memory_space<vmem>>, %arg4: memref<2x1x128xf32, #tpu.memory_space<vmem>>, %arg5: memref<2x4x32xf32, #tpu.memory_space<vmem>>, %arg6: memref<2x4x32xf32, #tpu.memory_space<vmem>>, %arg7: memref<32x32xf32, #tpu.memory_space<vmem>>) attributes {dimension_semantics = [], scalar_prefetch = 0 : i64, scratch_operands = 1 : i64, tpu.core_type = #tpu.core_type<tc>} {
    %c0 = arith.constant 0 : index
    %c0_0 = arith.constant 0 : index
    %0 = vector.load %arg0[%c0, %c0_0] : memref<32x16xbf16, #tpu.memory_space<vmem>>, vector<32x16xbf16>
    %c0_1 = arith.constant 0 : index
    %c0_2 = arith.constant 0 : index
    %1 = vector.load %arg1[%c0_1, %c0_2] : memref<16x128xbf16, #tpu.memory_space<vmem>>, vector<16x128xbf16>
    %cst = arith.constant dense<0.000000e+00> : vector<32x128xf32>
    %2 = tpu.matmul %0, %1, %cst {dimension_numbers = #tpu.dot_dimension_numbers<[1], [0], [0], [1], [0, 0, 1, 1], [], []>} : vector<32x16xbf16>, vector<16x128xbf16>, vector<32x128xf32> -> vector<32x128xf32>
    %c0_3 = arith.constant 0 : index
    %c0_4 = arith.constant 0 : index
    %c0_5 = arith.constant 0 : index
    %3 = vector.load %arg3[%c0_3, %c0_4, %c0_5] : memref<2x32x128xbf16, #tpu.memory_space<vmem>>, vector<1x32x128xbf16>
    %4 = vector.shape_cast %3 : vector<1x32x128xbf16> to vector<32x128xbf16>
    %c0_6 = arith.constant 0 : index
    %c0_7 = arith.constant 0 : index
    %c0_8 = arith.constant 0 : index
    %5 = vector.load %arg4[%c0_6, %c0_7, %c0_8] : memref<2x1x128xf32, #tpu.memory_space<vmem>>, vector<1x1x128xf32>
    %6 = vector.shape_cast %5 : vector<1x1x128xf32> to vector<1x128xf32>
    %cst_9 = arith.constant 0.000000e+00 : f32
    %7 = vector.broadcast %cst_9 : f32 to vector<4x32xf32>
    %cst_10 = arith.constant 0.000000e+00 : f32
    %8 = vector.broadcast %cst_10 : f32 to vector<4x32xf32>
    %9 = vector.extract_strided_slice %2 {offsets = [0, 0], sizes = [4, 128], strides = [1, 1]} : vector<32x128xf32> to vector<4x128xf32>
    %10 = arith.truncf %7 : vector<4x32xf32> to vector<4x32xbf16>
    %cst_11 = arith.constant dense<0.000000e+00> : vector<4x128xf32>
    %11 = tpu.matmul %10, %4, %cst_11 {dimension_numbers = #tpu.dot_dimension_numbers<[1], [0], [0], [1], [0, 0, 1, 1], [], []>} : vector<4x32xbf16>, vector<32x128xbf16>, vector<4x128xf32> -> vector<4x128xf32>
    %12 = arith.addf %9, %11 : vector<4x128xf32>
    %13 = vector.broadcast %6 : vector<1x128xf32> to vector<4x128xf32>
    %14 = arith.addf %12, %13 : vector<4x128xf32>
    %15 = arith.negf %14 : vector<4x128xf32>
    %16 = math.exp %15 : vector<4x128xf32>
    %cst_12 = arith.constant 1.000000e+00 : f32
    %17 = vector.broadcast %cst_12 : f32 to vector<4x128xf32>
    %18 = arith.addf %17, %16 : vector<4x128xf32>
    %19 = arith.divf %17, %18 : vector<4x128xf32>
    %20 = math.tanh %14 : vector<4x128xf32>
    %21 = vector.extract_strided_slice %19 {offsets = [0, 0], sizes = [4, 32], strides = [1, 1]} : vector<4x128xf32> to vector<4x32xf32>
    %22 = vector.extract_strided_slice %19 {offsets = [0, 32], sizes = [4, 32], strides = [1, 1]} : vector<4x128xf32> to vector<4x32xf32>
    %23 = vector.extract_strided_slice %20 {offsets = [0, 64], sizes = [4, 32], strides = [1, 1]} : vector<4x128xf32> to vector<4x32xf32>
    %24 = vector.extract_strided_slice %19 {offsets = [0, 96], sizes = [4, 32], strides = [1, 1]} : vector<4x128xf32> to vector<4x32xf32>
    %25 = arith.mulf %22, %8 : vector<4x32xf32>
    %26 = arith.mulf %21, %23 : vector<4x32xf32>
    %27 = arith.addf %25, %26 : vector<4x32xf32>
    %28 = math.tanh %27 : vector<4x32xf32>
    %29 = arith.mulf %24, %28 : vector<4x32xf32>
    %c0_13 = arith.constant 0 : index
    %c0_14 = arith.constant 0 : index
    %30 = vector.load %arg7[%c0_13, %c0_14] : memref<32x32xf32, #tpu.memory_space<vmem>>, vector<4x32xf32>
    tpu.vector_store %arg7[%c0_13, %c0_14], %29 {strides = array<i32>} : memref<32x32xf32, #tpu.memory_space<vmem>>, vector<4x32xf32>,
    %31 = vector.extract_strided_slice %2 {offsets = [4, 0], sizes = [4, 128], strides = [1, 1]} : vector<32x128xf32> to vector<4x128xf32>
    %32 = arith.truncf %29 : vector<4x32xf32> to vector<4x32xbf16>
    %cst_15 = arith.constant dense<0.000000e+00> : vector<4x128xf32>
    %33 = tpu.matmul %32, %4, %cst_15 {dimension_numbers = #tpu.dot_dimension_numbers<[1], [0], [0], [1], [0, 0, 1, 1], [], []>} : vector<4x32xbf16>, vector<32x128xbf16>, vector<4x128xf32> -> vector<4x128xf32>
    %34 = arith.addf %31, %33 : vector<4x128xf32>
    %35 = vector.broadcast %6 : vector<1x128xf32> to vector<4x128xf32>
    %36 = arith.addf %34, %35 : vector<4x128xf32>
    %37 = arith.negf %36 : vector<4x128xf32>
    %38 = math.exp %37 : vector<4x128xf32>
    %cst_16 = arith.constant 1.000000e+00 : f32
    %39 = vector.broadcast %cst_16 : f32 to vector<4x128xf32>
    %40 = arith.addf %39, %38 : vector<4x128xf32>
    %41 = arith.divf %39, %40 : vector<4x128xf32>
    %42 = math.tanh %36 : vector<4x128xf32>
    %43 = vector.extract_strided_slice %41 {offsets = [0, 0], sizes = [4, 32], strides = [1, 1]} : vector<4x128xf32> to vector<4x32xf32>
    %44 = vector.extract_strided_slice %41 {offsets = [0, 32], sizes = [4, 32], strides = [1, 1]} : vector<4x128xf32> to vector<4x32xf32>
    %45 = vector.extract_strided_slice %42 {offsets = [0, 64], sizes = [4, 32], strides = [1, 1]} : vector<4x128xf32> to vector<4x32xf32>
    %46 = vector.extract_strided_slice %41 {offsets = [0, 96], sizes = [4, 32], strides = [1, 1]} : vector<4x128xf32> to vector<4x32xf32>
    %47 = arith.mulf %44, %27 : vector<4x32xf32>
    %48 = arith.mulf %43, %45 : vector<4x32xf32>
    %49 = arith.addf %47, %48 : vector<4x32xf32>
    %50 = math.tanh %49 : vector<4x32xf32>
    %51 = arith.mulf %46, %50 : vector<4x32xf32>
    %c4 = arith.constant 4 : index
    %c0_17 = arith.constant 0 : index
    %52 = vector.load %arg7[%c4, %c0_17] : memref<32x32xf32, #tpu.memory_space<vmem>>, vector<4x32xf32>
    tpu.vector_store %arg7[%c4, %c0_17], %51 {strides = array<i32>} : memref<32x32xf32, #tpu.memory_space<vmem>>, vector<4x32xf32>,
    %53 = vector.extract_strided_slice %2 {offsets = [8, 0], sizes = [4, 128], strides = [1, 1]} : vector<32x128xf32> to vector<4x128xf32>
    %54 = arith.truncf %51 : vector<4x32xf32> to vector<4x32xbf16>
    %cst_18 = arith.constant dense<0.000000e+00> : vector<4x128xf32>
    %55 = tpu.matmul %54, %4, %cst_18 {dimension_numbers = #tpu.dot_dimension_numbers<[1], [0], [0], [1], [0, 0, 1, 1], [], []>} : vector<4x32xbf16>, vector<32x128xbf16>, vector<4x128xf32> -> vector<4x128xf32>
    %56 = arith.addf %53, %55 : vector<4x128xf32>
    %57 = vector.broadcast %6 : vector<1x128xf32> to vector<4x128xf32>
    %58 = arith.addf %56, %57 : vector<4x128xf32>
    %59 = arith.negf %58 : vector<4x128xf32>
    %60 = math.exp %59 : vector<4x128xf32>
    %cst_19 = arith.constant 1.000000e+00 : f32
    %61 = vector.broadcast %cst_19 : f32 to vector<4x128xf32>
    %62 = arith.addf %61, %60 : vector<4x128xf32>
    %63 = arith.divf %61, %62 : vector<4x128xf32>
    %64 = math.tanh %58 : vector<4x128xf32>
    %65 = vector.extract_strided_slice %63 {offsets = [0, 0], sizes = [4, 32], strides = [1, 1]} : vector<4x128xf32> to vector<4x32xf32>
    %66 = vector.extract_strided_slice %63 {offsets = [0, 32], sizes = [4, 32], strides = [1, 1]} : vector<4x128xf32> to vector<4x32xf32>
    %67 = vector.extract_strided_slice %64 {offsets = [0, 64], sizes = [4, 32], strides = [1, 1]} : vector<4x128xf32> to vector<4x32xf32>
    %68 = vector.extract_strided_slice %63 {offsets = [0, 96], sizes = [4, 32], strides = [1, 1]} : vector<4x128xf32> to vector<4x32xf32>
    %69 = arith.mulf %66, %49 : vector<4x32xf32>
    %70 = arith.mulf %65, %67 : vector<4x32xf32>
    %71 = arith.addf %69, %70 : vector<4x32xf32>
    %72 = math.tanh %71 : vector<4x32xf32>
    %73 = arith.mulf %68, %72 : vector<4x32xf32>
    %c8 = arith.constant 8 : index
    %c0_20 = arith.constant 0 : index
    %74 = vector.load %arg7[%c8, %c0_20] : memref<32x32xf32, #tpu.memory_space<vmem>>, vector<4x32xf32>
    tpu.vector_store %arg7[%c8, %c0_20], %73 {strides = array<i32>} : memref<32x32xf32, #tpu.memory_space<vmem>>, vector<4x32xf32>,
    %75 = vector.extract_strided_slice %2 {offsets = [12, 0], sizes = [4, 128], strides = [1, 1]} : vector<32x128xf32> to vector<4x128xf32>
    %76 = arith.truncf %73 : vector<4x32xf32> to vector<4x32xbf16>
    %cst_21 = arith.constant dense<0.000000e+00> : vector<4x128xf32>
    %77 = tpu.matmul %76, %4, %cst_21 {dimension_numbers = #tpu.dot_dimension_numbers<[1], [0], [0], [1], [0, 0, 1, 1], [], []>} : vector<4x32xbf16>, vector<32x128xbf16>, vector<4x128xf32> -> vector<4x128xf32>
    %78 = arith.addf %75, %77 : vector<4x128xf32>
    %79 = vector.broadcast %6 : vector<1x128xf32> to vector<4x128xf32>
    %80 = arith.addf %78, %79 : vector<4x128xf32>
    %81 = arith.negf %80 : vector<4x128xf32>
    %82 = math.exp %81 : vector<4x128xf32>
    %cst_22 = arith.constant 1.000000e+00 : f32
    %83 = vector.broadcast %cst_22 : f32 to vector<4x128xf32>
    %84 = arith.addf %83, %82 : vector<4x128xf32>
    %85 = arith.divf %83, %84 : vector<4x128xf32>
    %86 = math.tanh %80 : vector<4x128xf32>
    %87 = vector.extract_strided_slice %85 {offsets = [0, 0], sizes = [4, 32], strides = [1, 1]} : vector<4x128xf32> to vector<4x32xf32>
    %88 = vector.extract_strided_slice %85 {offsets = [0, 32], sizes = [4, 32], strides = [1, 1]} : vector<4x128xf32> to vector<4x32xf32>
    %89 = vector.extract_strided_slice %86 {offsets = [0, 64], sizes = [4, 32], strides = [1, 1]} : vector<4x128xf32> to vector<4x32xf32>
    %90 = vector.extract_strided_slice %85 {offsets = [0, 96], sizes = [4, 32], strides = [1, 1]} : vector<4x128xf32> to vector<4x32xf32>
    %91 = arith.mulf %88, %71 : vector<4x32xf32>
    %92 = arith.mulf %87, %89 : vector<4x32xf32>
    %93 = arith.addf %91, %92 : vector<4x32xf32>
    %94 = math.tanh %93 : vector<4x32xf32>
    %95 = arith.mulf %90, %94 : vector<4x32xf32>
    %c12 = arith.constant 12 : index
    %c0_23 = arith.constant 0 : index
    %96 = vector.load %arg7[%c12, %c0_23] : memref<32x32xf32, #tpu.memory_space<vmem>>, vector<4x32xf32>
    tpu.vector_store %arg7[%c12, %c0_23], %95 {strides = array<i32>} : memref<32x32xf32, #tpu.memory_space<vmem>>, vector<4x32xf32>,
    %97 = vector.extract_strided_slice %2 {offsets = [16, 0], sizes = [4, 128], strides = [1, 1]} : vector<32x128xf32> to vector<4x128xf32>
    %98 = arith.truncf %95 : vector<4x32xf32> to vector<4x32xbf16>
    %cst_24 = arith.constant dense<0.000000e+00> : vector<4x128xf32>
    %99 = tpu.matmul %98, %4, %cst_24 {dimension_numbers = #tpu.dot_dimension_numbers<[1], [0], [0], [1], [0, 0, 1, 1], [], []>} : vector<4x32xbf16>, vector<32x128xbf16>, vector<4x128xf32> -> vector<4x128xf32>
    %100 = arith.addf %97, %99 : vector<4x128xf32>
    %101 = vector.broadcast %6 : vector<1x128xf32> to vector<4x128xf32>
    %102 = arith.addf %100, %101 : vector<4x128xf32>
    %103 = arith.negf %102 : vector<4x128xf32>
    %104 = math.exp %103 : vector<4x128xf32>
    %cst_25 = arith.constant 1.000000e+00 : f32
    %105 = vector.broadcast %cst_25 : f32 to vector<4x128xf32>
    %106 = arith.addf %105, %104 : vector<4x128xf32>
    %107 = arith.divf %105, %106 : vector<4x128xf32>
    %108 = math.tanh %102 : vector<4x128xf32>
    %109 = vector.extract_strided_slice %107 {offsets = [0, 0], sizes = [4, 32], strides = [1, 1]} : vector<4x128xf32> to vector<4x32xf32>
    %110 = vector.extract_strided_slice %107 {offsets = [0, 32], sizes = [4, 32], strides = [1, 1]} : vector<4x128xf32> to vector<4x32xf32>
    %111 = vector.extract_strided_slice %108 {offsets = [0, 64], sizes = [4, 32], strides = [1, 1]} : vector<4x128xf32> to vector<4x32xf32>
    %112 = vector.extract_strided_slice %107 {offsets = [0, 96], sizes = [4, 32], strides = [1, 1]} : vector<4x128xf32> to vector<4x32xf32>
    %113 = arith.mulf %110, %93 : vector<4x32xf32>
    %114 = arith.mulf %109, %111 : vector<4x32xf32>
    %115 = arith.addf %113, %114 : vector<4x32xf32>
    %116 = math.tanh %115 : vector<4x32xf32>
    %117 = arith.mulf %112, %116 : vector<4x32xf32>
    %c16 = arith.constant 16 : index
    %c0_26 = arith.constant 0 : index
    %118 = vector.load %arg7[%c16, %c0_26] : memref<32x32xf32, #tpu.memory_space<vmem>>, vector<4x32xf32>
    tpu.vector_store %arg7[%c16, %c0_26], %117 {strides = array<i32>} : memref<32x32xf32, #tpu.memory_space<vmem>>, vector<4x32xf32>,
    %119 = vector.extract_strided_slice %2 {offsets = [20, 0], sizes = [4, 128], strides = [1, 1]} : vector<32x128xf32> to vector<4x128xf32>
    %120 = arith.truncf %117 : vector<4x32xf32> to vector<4x32xbf16>
    %cst_27 = arith.constant dense<0.000000e+00> : vector<4x128xf32>
    %121 = tpu.matmul %120, %4, %cst_27 {dimension_numbers = #tpu.dot_dimension_numbers<[1], [0], [0], [1], [0, 0, 1, 1], [], []>} : vector<4x32xbf16>, vector<32x128xbf16>, vector<4x128xf32> -> vector<4x128xf32>
    %122 = arith.addf %119, %121 : vector<4x128xf32>
    %123 = vector.broadcast %6 : vector<1x128xf32> to vector<4x128xf32>
    %124 = arith.addf %122, %123 : vector<4x128xf32>
    %125 = arith.negf %124 : vector<4x128xf32>
    %126 = math.exp %125 : vector<4x128xf32>
    %cst_28 = arith.constant 1.000000e+00 : f32
    %127 = vector.broadcast %cst_28 : f32 to vector<4x128xf32>
    %128 = arith.addf %127, %126 : vector<4x128xf32>
    %129 = arith.divf %127, %128 : vector<4x128xf32>
    %130 = math.tanh %124 : vector<4x128xf32>
    %131 = vector.extract_strided_slice %129 {offsets = [0, 0], sizes = [4, 32], strides = [1, 1]} : vector<4x128xf32> to vector<4x32xf32>
    %132 = vector.extract_strided_slice %129 {offsets = [0, 32], sizes = [4, 32], strides = [1, 1]} : vector<4x128xf32> to vector<4x32xf32>
    %133 = vector.extract_strided_slice %130 {offsets = [0, 64], sizes = [4, 32], strides = [1, 1]} : vector<4x128xf32> to vector<4x32xf32>
    %134 = vector.extract_strided_slice %129 {offsets = [0, 96], sizes = [4, 32], strides = [1, 1]} : vector<4x128xf32> to vector<4x32xf32>
    %135 = arith.mulf %132, %115 : vector<4x32xf32>
    %136 = arith.mulf %131, %133 : vector<4x32xf32>
    %137 = arith.addf %135, %136 : vector<4x32xf32>
    %138 = math.tanh %137 : vector<4x32xf32>
    %139 = arith.mulf %134, %138 : vector<4x32xf32>
    %c20 = arith.constant 20 : index
    %c0_29 = arith.constant 0 : index
    %140 = vector.load %arg7[%c20, %c0_29] : memref<32x32xf32, #tpu.memory_space<vmem>>, vector<4x32xf32>
    tpu.vector_store %arg7[%c20, %c0_29], %139 {strides = array<i32>} : memref<32x32xf32, #tpu.memory_space<vmem>>, vector<4x32xf32>,
    %141 = vector.extract_strided_slice %2 {offsets = [24, 0], sizes = [4, 128], strides = [1, 1]} : vector<32x128xf32> to vector<4x128xf32>
    %142 = arith.truncf %139 : vector<4x32xf32> to vector<4x32xbf16>
    %cst_30 = arith.constant dense<0.000000e+00> : vector<4x128xf32>
    %143 = tpu.matmul %142, %4, %cst_30 {dimension_numbers = #tpu.dot_dimension_numbers<[1], [0], [0], [1], [0, 0, 1, 1], [], []>} : vector<4x32xbf16>, vector<32x128xbf16>, vector<4x128xf32> -> vector<4x128xf32>
    %144 = arith.addf %141, %143 : vector<4x128xf32>
    %145 = vector.broadcast %6 : vector<1x128xf32> to vector<4x128xf32>
    %146 = arith.addf %144, %145 : vector<4x128xf32>
    %147 = arith.negf %146 : vector<4x128xf32>
    %148 = math.exp %147 : vector<4x128xf32>
    %cst_31 = arith.constant 1.000000e+00 : f32
    %149 = vector.broadcast %cst_31 : f32 to vector<4x128xf32>
    %150 = arith.addf %149, %148 : vector<4x128xf32>
    %151 = arith.divf %149, %150 : vector<4x128xf32>
    %152 = math.tanh %146 : vector<4x128xf32>
    %153 = vector.extract_strided_slice %151 {offsets = [0, 0], sizes = [4, 32], strides = [1, 1]} : vector<4x128xf32> to vector<4x32xf32>
    %154 = vector.extract_strided_slice %151 {offsets = [0, 32], sizes = [4, 32], strides = [1, 1]} : vector<4x128xf32> to vector<4x32xf32>
    %155 = vector.extract_strided_slice %152 {offsets = [0, 64], sizes = [4, 32], strides = [1, 1]} : vector<4x128xf32> to vector<4x32xf32>
    %156 = vector.extract_strided_slice %151 {offsets = [0, 96], sizes = [4, 32], strides = [1, 1]} : vector<4x128xf32> to vector<4x32xf32>
    %157 = arith.mulf %154, %137 : vector<4x32xf32>
    %158 = arith.mulf %153, %155 : vector<4x32xf32>
    %159 = arith.addf %157, %158 : vector<4x32xf32>
    %160 = math.tanh %159 : vector<4x32xf32>
    %161 = arith.mulf %156, %160 : vector<4x32xf32>
    %c24 = arith.constant 24 : index
    %c0_32 = arith.constant 0 : index
    %162 = vector.load %arg7[%c24, %c0_32] : memref<32x32xf32, #tpu.memory_space<vmem>>, vector<4x32xf32>
    tpu.vector_store %arg7[%c24, %c0_32], %161 {strides = array<i32>} : memref<32x32xf32, #tpu.memory_space<vmem>>, vector<4x32xf32>,
    %163 = vector.extract_strided_slice %2 {offsets = [28, 0], sizes = [4, 128], strides = [1, 1]} : vector<32x128xf32> to vector<4x128xf32>
    %164 = arith.truncf %161 : vector<4x32xf32> to vector<4x32xbf16>
    %cst_33 = arith.constant dense<0.000000e+00> : vector<4x128xf32>
    %165 = tpu.matmul %164, %4, %cst_33 {dimension_numbers = #tpu.dot_dimension_numbers<[1], [0], [0], [1], [0, 0, 1, 1], [], []>} : vector<4x32xbf16>, vector<32x128xbf16>, vector<4x128xf32> -> vector<4x128xf32>
    %166 = arith.addf %163, %165 : vector<4x128xf32>
    %167 = vector.broadcast %6 : vector<1x128xf32> to vector<4x128xf32>
    %168 = arith.addf %166, %167 : vector<4x128xf32>
    %169 = arith.negf %168 : vector<4x128xf32>
    %170 = math.exp %169 : vector<4x128xf32>
    %cst_34 = arith.constant 1.000000e+00 : f32
    %171 = vector.broadcast %cst_34 : f32 to vector<4x128xf32>
    %172 = arith.addf %171, %170 : vector<4x128xf32>
    %173 = arith.divf %171, %172 : vector<4x128xf32>
    %174 = math.tanh %168 : vector<4x128xf32>
    %175 = vector.extract_strided_slice %173 {offsets = [0, 0], sizes = [4, 32], strides = [1, 1]} : vector<4x128xf32> to vector<4x32xf32>
    %176 = vector.extract_strided_slice %173 {offsets = [0, 32], sizes = [4, 32], strides = [1, 1]} : vector<4x128xf32> to vector<4x32xf32>
    %177 = vector.extract_strided_slice %174 {offsets = [0, 64], sizes = [4, 32], strides = [1, 1]} : vector<4x128xf32> to vector<4x32xf32>
    %178 = vector.extract_strided_slice %173 {offsets = [0, 96], sizes = [4, 32], strides = [1, 1]} : vector<4x128xf32> to vector<4x32xf32>
    %179 = arith.mulf %176, %159 : vector<4x32xf32>
    %180 = arith.mulf %175, %177 : vector<4x32xf32>
    %181 = arith.addf %179, %180 : vector<4x32xf32>
    %182 = math.tanh %181 : vector<4x32xf32>
    %183 = arith.mulf %178, %182 : vector<4x32xf32>
    %c28 = arith.constant 28 : index
    %c0_35 = arith.constant 0 : index
    %184 = vector.load %arg7[%c28, %c0_35] : memref<32x32xf32, #tpu.memory_space<vmem>>, vector<4x32xf32>
    tpu.vector_store %arg7[%c28, %c0_35], %183 {strides = array<i32>} : memref<32x32xf32, #tpu.memory_space<vmem>>, vector<4x32xf32>,
    %c0_36 = arith.constant 0 : index
    %c0_37 = arith.constant 0 : index
    %c0_38 = arith.constant 0 : index
    %185 = vector.load %arg5[%c0_36, %c0_37, %c0_38] : memref<2x4x32xf32, #tpu.memory_space<vmem>>, vector<1x4x32xf32>
    %186 = vector.shape_cast %185 : vector<1x4x32xf32> to vector<4x32xf32>
    %187 = vector.shape_cast %183 : vector<4x32xf32> to vector<1x4x32xf32>
    tpu.vector_store %arg5[%c0_36, %c0_37, %c0_38], %187 {strides = array<i32>} : memref<2x4x32xf32, #tpu.memory_space<vmem>>, vector<1x4x32xf32>,
    %c0_39 = arith.constant 0 : index
    %c0_40 = arith.constant 0 : index
    %c0_41 = arith.constant 0 : index
    %188 = vector.load %arg6[%c0_39, %c0_40, %c0_41] : memref<2x4x32xf32, #tpu.memory_space<vmem>>, vector<1x4x32xf32>
    %189 = vector.shape_cast %188 : vector<1x4x32xf32> to vector<4x32xf32>
    %190 = vector.shape_cast %181 : vector<4x32xf32> to vector<1x4x32xf32>
    tpu.vector_store %arg6[%c0_39, %c0_40, %c0_41], %190 {strides = array<i32>} : memref<2x4x32xf32, #tpu.memory_space<vmem>>, vector<1x4x32xf32>,
    %c0_42 = arith.constant 0 : index
    %c0_43 = arith.constant 0 : index
    %191 = vector.load %arg7[%c0_42, %c0_43] : memref<32x32xf32, #tpu.memory_space<vmem>>, vector<32x32xf32>
    %192 = arith.truncf %191 : vector<32x32xf32> to vector<32x32xbf16>
    %c0_44 = arith.constant 0 : index
    %c0_45 = arith.constant 0 : index
    %c0_46 = arith.constant 0 : index
    %193 = vector.load %arg2[%c0_44, %c0_45, %c0_46] : memref<1x32x128xbf16, #tpu.memory_space<vmem>>, vector<1x32x128xbf16>
    %194 = vector.shape_cast %193 : vector<1x32x128xbf16> to vector<32x128xbf16>
    %cst_47 = arith.constant dense<0.000000e+00> : vector<32x128xf32>
    %195 = tpu.matmul %192, %194, %cst_47 {dimension_numbers = #tpu.dot_dimension_numbers<[1], [0], [0], [1], [0, 0, 1, 1], [], []>} : vector<32x32xbf16>, vector<32x128xbf16>, vector<32x128xf32> -> vector<32x128xf32>
    %c1 = arith.constant 1 : index
    %c0_48 = arith.constant 0 : index
    %c0_49 = arith.constant 0 : index
    %196 = vector.load %arg3[%c1, %c0_48, %c0_49] : memref<2x32x128xbf16, #tpu.memory_space<vmem>>, vector<1x32x128xbf16>
    %197 = vector.shape_cast %196 : vector<1x32x128xbf16> to vector<32x128xbf16>
    %c1_50 = arith.constant 1 : index
    %c0_51 = arith.constant 0 : index
    %c0_52 = arith.constant 0 : index
    %198 = vector.load %arg4[%c1_50, %c0_51, %c0_52] : memref<2x1x128xf32, #tpu.memory_space<vmem>>, vector<1x1x128xf32>
    %199 = vector.shape_cast %198 : vector<1x1x128xf32> to vector<1x128xf32>
    %cst_53 = arith.constant 0.000000e+00 : f32
    %200 = vector.broadcast %cst_53 : f32 to vector<4x32xf32>
    %cst_54 = arith.constant 0.000000e+00 : f32
    %201 = vector.broadcast %cst_54 : f32 to vector<4x32xf32>
    %202 = vector.extract_strided_slice %195 {offsets = [0, 0], sizes = [4, 128], strides = [1, 1]} : vector<32x128xf32> to vector<4x128xf32>
    %203 = arith.truncf %200 : vector<4x32xf32> to vector<4x32xbf16>
    %cst_55 = arith.constant dense<0.000000e+00> : vector<4x128xf32>
    %204 = tpu.matmul %203, %197, %cst_55 {dimension_numbers = #tpu.dot_dimension_numbers<[1], [0], [0], [1], [0, 0, 1, 1], [], []>} : vector<4x32xbf16>, vector<32x128xbf16>, vector<4x128xf32> -> vector<4x128xf32>
    %205 = arith.addf %202, %204 : vector<4x128xf32>
    %206 = vector.broadcast %199 : vector<1x128xf32> to vector<4x128xf32>
    %207 = arith.addf %205, %206 : vector<4x128xf32>
    %208 = arith.negf %207 : vector<4x128xf32>
    %209 = math.exp %208 : vector<4x128xf32>
    %cst_56 = arith.constant 1.000000e+00 : f32
    %210 = vector.broadcast %cst_56 : f32 to vector<4x128xf32>
    %211 = arith.addf %210, %209 : vector<4x128xf32>
    %212 = arith.divf %210, %211 : vector<4x128xf32>
    %213 = math.tanh %207 : vector<4x128xf32>
    %214 = vector.extract_strided_slice %212 {offsets = [0, 0], sizes = [4, 32], strides = [1, 1]} : vector<4x128xf32> to vector<4x32xf32>
    %215 = vector.extract_strided_slice %212 {offsets = [0, 32], sizes = [4, 32], strides = [1, 1]} : vector<4x128xf32> to vector<4x32xf32>
    %216 = vector.extract_strided_slice %213 {offsets = [0, 64], sizes = [4, 32], strides = [1, 1]} : vector<4x128xf32> to vector<4x32xf32>
    %217 = vector.extract_strided_slice %212 {offsets = [0, 96], sizes = [4, 32], strides = [1, 1]} : vector<4x128xf32> to vector<4x32xf32>
    %218 = arith.mulf %215, %201 : vector<4x32xf32>
    %219 = arith.mulf %214, %216 : vector<4x32xf32>
    %220 = arith.addf %218, %219 : vector<4x32xf32>
    %221 = math.tanh %220 : vector<4x32xf32>
    %222 = arith.mulf %217, %221 : vector<4x32xf32>
    %223 = vector.extract_strided_slice %195 {offsets = [4, 0], sizes = [4, 128], strides = [1, 1]} : vector<32x128xf32> to vector<4x128xf32>
    %224 = arith.truncf %222 : vector<4x32xf32> to vector<4x32xbf16>
    %cst_57 = arith.constant dense<0.000000e+00> : vector<4x128xf32>
    %225 = tpu.matmul %224, %197, %cst_57 {dimension_numbers = #tpu.dot_dimension_numbers<[1], [0], [0], [1], [0, 0, 1, 1], [], []>} : vector<4x32xbf16>, vector<32x128xbf16>, vector<4x128xf32> -> vector<4x128xf32>
    %226 = arith.addf %223, %225 : vector<4x128xf32>
    %227 = vector.broadcast %199 : vector<1x128xf32> to vector<4x128xf32>
    %228 = arith.addf %226, %227 : vector<4x128xf32>
    %229 = arith.negf %228 : vector<4x128xf32>
    %230 = math.exp %229 : vector<4x128xf32>
    %cst_58 = arith.constant 1.000000e+00 : f32
    %231 = vector.broadcast %cst_58 : f32 to vector<4x128xf32>
    %232 = arith.addf %231, %230 : vector<4x128xf32>
    %233 = arith.divf %231, %232 : vector<4x128xf32>
    %234 = math.tanh %228 : vector<4x128xf32>
    %235 = vector.extract_strided_slice %233 {offsets = [0, 0], sizes = [4, 32], strides = [1, 1]} : vector<4x128xf32> to vector<4x32xf32>
    %236 = vector.extract_strided_slice %233 {offsets = [0, 32], sizes = [4, 32], strides = [1, 1]} : vector<4x128xf32> to vector<4x32xf32>
    %237 = vector.extract_strided_slice %234 {offsets = [0, 64], sizes = [4, 32], strides = [1, 1]} : vector<4x128xf32> to vector<4x32xf32>
    %238 = vector.extract_strided_slice %233 {offsets = [0, 96], sizes = [4, 32], strides = [1, 1]} : vector<4x128xf32> to vector<4x32xf32>
    %239 = arith.mulf %236, %220 : vector<4x32xf32>
    %240 = arith.mulf %235, %237 : vector<4x32xf32>
    %241 = arith.addf %239, %240 : vector<4x32xf32>
    %242 = math.tanh %241 : vector<4x32xf32>
    %243 = arith.mulf %238, %242 : vector<4x32xf32>
    %244 = vector.extract_strided_slice %195 {offsets = [8, 0], sizes = [4, 128], strides = [1, 1]} : vector<32x128xf32> to vector<4x128xf32>
    %245 = arith.truncf %243 : vector<4x32xf32> to vector<4x32xbf16>
    %cst_59 = arith.constant dense<0.000000e+00> : vector<4x128xf32>
    %246 = tpu.matmul %245, %197, %cst_59 {dimension_numbers = #tpu.dot_dimension_numbers<[1], [0], [0], [1], [0, 0, 1, 1], [], []>} : vector<4x32xbf16>, vector<32x128xbf16>, vector<4x128xf32> -> vector<4x128xf32>
    %247 = arith.addf %244, %246 : vector<4x128xf32>
    %248 = vector.broadcast %199 : vector<1x128xf32> to vector<4x128xf32>
    %249 = arith.addf %247, %248 : vector<4x128xf32>
    %250 = arith.negf %249 : vector<4x128xf32>
    %251 = math.exp %250 : vector<4x128xf32>
    %cst_60 = arith.constant 1.000000e+00 : f32
    %252 = vector.broadcast %cst_60 : f32 to vector<4x128xf32>
    %253 = arith.addf %252, %251 : vector<4x128xf32>
    %254 = arith.divf %252, %253 : vector<4x128xf32>
    %255 = math.tanh %249 : vector<4x128xf32>
    %256 = vector.extract_strided_slice %254 {offsets = [0, 0], sizes = [4, 32], strides = [1, 1]} : vector<4x128xf32> to vector<4x32xf32>
    %257 = vector.extract_strided_slice %254 {offsets = [0, 32], sizes = [4, 32], strides = [1, 1]} : vector<4x128xf32> to vector<4x32xf32>
    %258 = vector.extract_strided_slice %255 {offsets = [0, 64], sizes = [4, 32], strides = [1, 1]} : vector<4x128xf32> to vector<4x32xf32>
    %259 = vector.extract_strided_slice %254 {offsets = [0, 96], sizes = [4, 32], strides = [1, 1]} : vector<4x128xf32> to vector<4x32xf32>
    %260 = arith.mulf %257, %241 : vector<4x32xf32>
    %261 = arith.mulf %256, %258 : vector<4x32xf32>
    %262 = arith.addf %260, %261 : vector<4x32xf32>
    %263 = math.tanh %262 : vector<4x32xf32>
    %264 = arith.mulf %259, %263 : vector<4x32xf32>
    %265 = vector.extract_strided_slice %195 {offsets = [12, 0], sizes = [4, 128], strides = [1, 1]} : vector<32x128xf32> to vector<4x128xf32>
    %266 = arith.truncf %264 : vector<4x32xf32> to vector<4x32xbf16>
    %cst_61 = arith.constant dense<0.000000e+00> : vector<4x128xf32>
    %267 = tpu.matmul %266, %197, %cst_61 {dimension_numbers = #tpu.dot_dimension_numbers<[1], [0], [0], [1], [0, 0, 1, 1], [], []>} : vector<4x32xbf16>, vector<32x128xbf16>, vector<4x128xf32> -> vector<4x128xf32>
    %268 = arith.addf %265, %267 : vector<4x128xf32>
    %269 = vector.broadcast %199 : vector<1x128xf32> to vector<4x128xf32>
    %270 = arith.addf %268, %269 : vector<4x128xf32>
    %271 = arith.negf %270 : vector<4x128xf32>
    %272 = math.exp %271 : vector<4x128xf32>
    %cst_62 = arith.constant 1.000000e+00 : f32
    %273 = vector.broadcast %cst_62 : f32 to vector<4x128xf32>
    %274 = arith.addf %273, %272 : vector<4x128xf32>
    %275 = arith.divf %273, %274 : vector<4x128xf32>
    %276 = math.tanh %270 : vector<4x128xf32>
    %277 = vector.extract_strided_slice %275 {offsets = [0, 0], sizes = [4, 32], strides = [1, 1]} : vector<4x128xf32> to vector<4x32xf32>
    %278 = vector.extract_strided_slice %275 {offsets = [0, 32], sizes = [4, 32], strides = [1, 1]} : vector<4x128xf32> to vector<4x32xf32>
    %279 = vector.extract_strided_slice %276 {offsets = [0, 64], sizes = [4, 32], strides = [1, 1]} : vector<4x128xf32> to vector<4x32xf32>
    %280 = vector.extract_strided_slice %275 {offsets = [0, 96], sizes = [4, 32], strides = [1, 1]} : vector<4x128xf32> to vector<4x32xf32>
    %281 = arith.mulf %278, %262 : vector<4x32xf32>
    %282 = arith.mulf %277, %279 : vector<4x32xf32>
    %283 = arith.addf %281, %282 : vector<4x32xf32>
    %284 = math.tanh %283 : vector<4x32xf32>
    %285 = arith.mulf %280, %284 : vector<4x32xf32>
    %286 = vector.extract_strided_slice %195 {offsets = [16, 0], sizes = [4, 128], strides = [1, 1]} : vector<32x128xf32> to vector<4x128xf32>
    %287 = arith.truncf %285 : vector<4x32xf32> to vector<4x32xbf16>
    %cst_63 = arith.constant dense<0.000000e+00> : vector<4x128xf32>
    %288 = tpu.matmul %287, %197, %cst_63 {dimension_numbers = #tpu.dot_dimension_numbers<[1], [0], [0], [1], [0, 0, 1, 1], [], []>} : vector<4x32xbf16>, vector<32x128xbf16>, vector<4x128xf32> -> vector<4x128xf32>
    %289 = arith.addf %286, %288 : vector<4x128xf32>
    %290 = vector.broadcast %199 : vector<1x128xf32> to vector<4x128xf32>
    %291 = arith.addf %289, %290 : vector<4x128xf32>
    %292 = arith.negf %291 : vector<4x128xf32>
    %293 = math.exp %292 : vector<4x128xf32>
    %cst_64 = arith.constant 1.000000e+00 : f32
    %294 = vector.broadcast %cst_64 : f32 to vector<4x128xf32>
    %295 = arith.addf %294, %293 : vector<4x128xf32>
    %296 = arith.divf %294, %295 : vector<4x128xf32>
    %297 = math.tanh %291 : vector<4x128xf32>
    %298 = vector.extract_strided_slice %296 {offsets = [0, 0], sizes = [4, 32], strides = [1, 1]} : vector<4x128xf32> to vector<4x32xf32>
    %299 = vector.extract_strided_slice %296 {offsets = [0, 32], sizes = [4, 32], strides = [1, 1]} : vector<4x128xf32> to vector<4x32xf32>
    %300 = vector.extract_strided_slice %297 {offsets = [0, 64], sizes = [4, 32], strides = [1, 1]} : vector<4x128xf32> to vector<4x32xf32>
    %301 = vector.extract_strided_slice %296 {offsets = [0, 96], sizes = [4, 32], strides = [1, 1]} : vector<4x128xf32> to vector<4x32xf32>
    %302 = arith.mulf %299, %283 : vector<4x32xf32>
    %303 = arith.mulf %298, %300 : vector<4x32xf32>
    %304 = arith.addf %302, %303 : vector<4x32xf32>
    %305 = math.tanh %304 : vector<4x32xf32>
    %306 = arith.mulf %301, %305 : vector<4x32xf32>
    %307 = vector.extract_strided_slice %195 {offsets = [20, 0], sizes = [4, 128], strides = [1, 1]} : vector<32x128xf32> to vector<4x128xf32>
    %308 = arith.truncf %306 : vector<4x32xf32> to vector<4x32xbf16>
    %cst_65 = arith.constant dense<0.000000e+00> : vector<4x128xf32>
    %309 = tpu.matmul %308, %197, %cst_65 {dimension_numbers = #tpu.dot_dimension_numbers<[1], [0], [0], [1], [0, 0, 1, 1], [], []>} : vector<4x32xbf16>, vector<32x128xbf16>, vector<4x128xf32> -> vector<4x128xf32>
    %310 = arith.addf %307, %309 : vector<4x128xf32>
    %311 = vector.broadcast %199 : vector<1x128xf32> to vector<4x128xf32>
    %312 = arith.addf %310, %311 : vector<4x128xf32>
    %313 = arith.negf %312 : vector<4x128xf32>
    %314 = math.exp %313 : vector<4x128xf32>
    %cst_66 = arith.constant 1.000000e+00 : f32
    %315 = vector.broadcast %cst_66 : f32 to vector<4x128xf32>
    %316 = arith.addf %315, %314 : vector<4x128xf32>
    %317 = arith.divf %315, %316 : vector<4x128xf32>
    %318 = math.tanh %312 : vector<4x128xf32>
    %319 = vector.extract_strided_slice %317 {offsets = [0, 0], sizes = [4, 32], strides = [1, 1]} : vector<4x128xf32> to vector<4x32xf32>
    %320 = vector.extract_strided_slice %317 {offsets = [0, 32], sizes = [4, 32], strides = [1, 1]} : vector<4x128xf32> to vector<4x32xf32>
    %321 = vector.extract_strided_slice %318 {offsets = [0, 64], sizes = [4, 32], strides = [1, 1]} : vector<4x128xf32> to vector<4x32xf32>
    %322 = vector.extract_strided_slice %317 {offsets = [0, 96], sizes = [4, 32], strides = [1, 1]} : vector<4x128xf32> to vector<4x32xf32>
    %323 = arith.mulf %320, %304 : vector<4x32xf32>
    %324 = arith.mulf %319, %321 : vector<4x32xf32>
    %325 = arith.addf %323, %324 : vector<4x32xf32>
    %326 = math.tanh %325 : vector<4x32xf32>
    %327 = arith.mulf %322, %326 : vector<4x32xf32>
    %328 = vector.extract_strided_slice %195 {offsets = [24, 0], sizes = [4, 128], strides = [1, 1]} : vector<32x128xf32> to vector<4x128xf32>
    %329 = arith.truncf %327 : vector<4x32xf32> to vector<4x32xbf16>
    %cst_67 = arith.constant dense<0.000000e+00> : vector<4x128xf32>
    %330 = tpu.matmul %329, %197, %cst_67 {dimension_numbers = #tpu.dot_dimension_numbers<[1], [0], [0], [1], [0, 0, 1, 1], [], []>} : vector<4x32xbf16>, vector<32x128xbf16>, vector<4x128xf32> -> vector<4x128xf32>
    %331 = arith.addf %328, %330 : vector<4x128xf32>
    %332 = vector.broadcast %199 : vector<1x128xf32> to vector<4x128xf32>
    %333 = arith.addf %331, %332 : vector<4x128xf32>
    %334 = arith.negf %333 : vector<4x128xf32>
    %335 = math.exp %334 : vector<4x128xf32>
    %cst_68 = arith.constant 1.000000e+00 : f32
    %336 = vector.broadcast %cst_68 : f32 to vector<4x128xf32>
    %337 = arith.addf %336, %335 : vector<4x128xf32>
    %338 = arith.divf %336, %337 : vector<4x128xf32>
    %339 = math.tanh %333 : vector<4x128xf32>
    %340 = vector.extract_strided_slice %338 {offsets = [0, 0], sizes = [4, 32], strides = [1, 1]} : vector<4x128xf32> to vector<4x32xf32>
    %341 = vector.extract_strided_slice %338 {offsets = [0, 32], sizes = [4, 32], strides = [1, 1]} : vector<4x128xf32> to vector<4x32xf32>
    %342 = vector.extract_strided_slice %339 {offsets = [0, 64], sizes = [4, 32], strides = [1, 1]} : vector<4x128xf32> to vector<4x32xf32>
    %343 = vector.extract_strided_slice %338 {offsets = [0, 96], sizes = [4, 32], strides = [1, 1]} : vector<4x128xf32> to vector<4x32xf32>
    %344 = arith.mulf %341, %325 : vector<4x32xf32>
    %345 = arith.mulf %340, %342 : vector<4x32xf32>
    %346 = arith.addf %344, %345 : vector<4x32xf32>
    %347 = math.tanh %346 : vector<4x32xf32>
    %348 = arith.mulf %343, %347 : vector<4x32xf32>
    %349 = vector.extract_strided_slice %195 {offsets = [28, 0], sizes = [4, 128], strides = [1, 1]} : vector<32x128xf32> to vector<4x128xf32>
    %350 = arith.truncf %348 : vector<4x32xf32> to vector<4x32xbf16>
    %cst_69 = arith.constant dense<0.000000e+00> : vector<4x128xf32>
    %351 = tpu.matmul %350, %197, %cst_69 {dimension_numbers = #tpu.dot_dimension_numbers<[1], [0], [0], [1], [0, 0, 1, 1], [], []>} : vector<4x32xbf16>, vector<32x128xbf16>, vector<4x128xf32> -> vector<4x128xf32>
    %352 = arith.addf %349, %351 : vector<4x128xf32>
    %353 = vector.broadcast %199 : vector<1x128xf32> to vector<4x128xf32>
    %354 = arith.addf %352, %353 : vector<4x128xf32>
    %355 = arith.negf %354 : vector<4x128xf32>
    %356 = math.exp %355 : vector<4x128xf32>
    %cst_70 = arith.constant 1.000000e+00 : f32
    %357 = vector.broadcast %cst_70 : f32 to vector<4x128xf32>
    %358 = arith.addf %357, %356 : vector<4x128xf32>
    %359 = arith.divf %357, %358 : vector<4x128xf32>
    %360 = math.tanh %354 : vector<4x128xf32>
    %361 = vector.extract_strided_slice %359 {offsets = [0, 0], sizes = [4, 32], strides = [1, 1]} : vector<4x128xf32> to vector<4x32xf32>
    %362 = vector.extract_strided_slice %359 {offsets = [0, 32], sizes = [4, 32], strides = [1, 1]} : vector<4x128xf32> to vector<4x32xf32>
    %363 = vector.extract_strided_slice %360 {offsets = [0, 64], sizes = [4, 32], strides = [1, 1]} : vector<4x128xf32> to vector<4x32xf32>
    %364 = vector.extract_strided_slice %359 {offsets = [0, 96], sizes = [4, 32], strides = [1, 1]} : vector<4x128xf32> to vector<4x32xf32>
    %365 = arith.mulf %362, %346 : vector<4x32xf32>
    %366 = arith.mulf %361, %363 : vector<4x32xf32>
    %367 = arith.addf %365, %366 : vector<4x32xf32>
    %368 = math.tanh %367 : vector<4x32xf32>
    %369 = arith.mulf %364, %368 : vector<4x32xf32>
    %c1_71 = arith.constant 1 : index
    %c0_72 = arith.constant 0 : index
    %c0_73 = arith.constant 0 : index
    %370 = vector.load %arg5[%c1_71, %c0_72, %c0_73] : memref<2x4x32xf32, #tpu.memory_space<vmem>>, vector<1x4x32xf32>
    %371 = vector.shape_cast %370 : vector<1x4x32xf32> to vector<4x32xf32>
    %372 = vector.shape_cast %369 : vector<4x32xf32> to vector<1x4x32xf32>
    tpu.vector_store %arg5[%c1_71, %c0_72, %c0_73], %372 {strides = array<i32>} : memref<2x4x32xf32, #tpu.memory_space<vmem>>, vector<1x4x32xf32>,
    %c1_74 = arith.constant 1 : index
    %c0_75 = arith.constant 0 : index
    %c0_76 = arith.constant 0 : index
    %373 = vector.load %arg6[%c1_74, %c0_75, %c0_76] : memref<2x4x32xf32, #tpu.memory_space<vmem>>, vector<1x4x32xf32>
    %374 = vector.shape_cast %373 : vector<1x4x32xf32> to vector<4x32xf32>
    %375 = vector.shape_cast %367 : vector<4x32xf32> to vector<1x4x32xf32>
    tpu.vector_store %arg6[%c1_74, %c0_75, %c0_76], %375 {strides = array<i32>} : memref<2x4x32xf32, #tpu.memory_space<vmem>>, vector<1x4x32xf32>,
    return
  }
}

</mosaic_0001>

<bundles_post_ra>
// kernel: eq.1
= control target key start
LH: loop header
LB: loop body
LE: loop exit
PB: predicated region body
PF: predicated region fallthrough
CT: control target
= control target key end

     0   :  { %s67_s10 = smov 28   ;;  %s68_s11 = smov 20   ;;  %vm3_vm0 = vcmask 31744   ;;  %vm9_vm1 = vcmask 261344   ;;  %vm15_vm2 = vcmask 228544   ;;  %vm21_vm3 = vcmask 195744   ;;  %s111_s0 = inlined_call_operand.vmem [shape: s32[8,4], index: 0, kind: input, shape index: {}]   ;;  %s112_s1 = inlined_call_operand.vmem [shape: s32[32], index: 1, kind: output, shape index: {}]  }
   0x1   :  { %v53_v0 = vld [vmem:[%s111_s0 + $0x7] sm:$0x1]   ;;  %v55_v1 = vld [vmem:[%s111_s0 + $0x5] sm:$0x1]   ;;  %v54_v2 = vld [vmem:[%s111_s0 + $0x6] sm:$0x1]  }
   0x2   :  { %7 = vrot.lane.b32.xlu0 %v53_v0, %s67_s10  ;;  %19 = vrot.lane.b32.xlu1 %v55_v1, %s68_s11  ;;  %v56_v3 = vld [vmem:[%s111_s0 + $0x4] sm:$0x1]   ;;  %v2_v4 = vld [vmem:[%s111_s0] sm:$0x1]   ;;  %s69_s18 = smov 24   ;;  %s70_s19 = smov 16  }
   0x3   :  { %4 = vst.msk [vmem:[#allocation0] sm:$0x1] %vm3_vm0, %v2_v4   ;;  %v57_v5 = vld [vmem:[%s111_s0 + $0x3] sm:$0x1]   ;;  %v58_v6 = vld [vmem:[%s111_s0 + $0x2] sm:$0x1]  }
   0x4   :  { %s71_s24 = smov 12   ;;  %s72_s25 = smov 8   ;;  %v59_v7 = vld [vmem:[%s111_s0 + $0x1] sm:$0x1]   ;;  %vm27_vm4 = vcmask 162944   ;;  %vm33_vm5 = vcmask 130144  }
   0x5   :  { %s73_s0 = smov 4   ;;  %vm39_vm6 = vcmask 97344   ;;  %vm45_vm7 = vcmask 64544  }
   0x6   :  { %13 = vrot.lane.b32.xlu0 %v54_v2, %s69_s18  ;;  %25 = vrot.lane.b32.xlu1 %v56_v3, %s70_s19 }
   0xa   :  { %31 = vrot.lane.b32.xlu0 %v57_v5, %s71_s24  ;;  %37 = vrot.lane.b32.xlu1 %v58_v6, %s72_s25 }
   0xe   :  { %43 = vrot.lane.b32.xlu0 %v59_v7, %s73_s0 }
  0x74   :  { %v8_v8 = vpop.permute.xlu0 %7   ;;  %v20_v9 = vpop.permute.xlu1 %19  }
  0x75   :  { %10 = vst.msk [vmem:[#allocation0] sm:$0x1] %vm9_vm1, %v8_v8  }
  0x78   :  { %v14_v10 = vpop.permute.xlu0 %13   ;;  %v26_v11 = vpop.permute.xlu1 %25  }
  0x79   :  { %16 = vst.msk [vmem:[#allocation0] sm:$0x1] %vm15_vm2, %v14_v10  }
  0x7a   :  { %22 = vst.msk [vmem:[#allocation0] sm:$0x1] %vm21_vm3, %v20_v9  }
  0x7b   :  { %28 = vst.msk [vmem:[#allocation0] sm:$0x1] %vm27_vm4, %v26_v11  }
  0x7c   :  { %v32_v12 = vpop.permute.xlu0 %31   ;;  %v38_v13 = vpop.permute.xlu1 %37  }
  0x7d   :  { %34 = vst.msk [vmem:[#allocation0] sm:$0x1] %vm33_vm5, %v32_v12  }
  0x7e   :  { %40 = vst.msk [vmem:[#allocation0] sm:$0x1] %vm39_vm6, %v38_v13  }
  0x80   :  { %v44_v14 = vpop.permute.xlu0 %43  }
  0x81   :  { %46 = vst.msk [vmem:[#allocation0] sm:$0x1] %vm45_vm7, %v44_v14  }
  0x88   :  { %v50_v15 = vld [vmem:[#allocation0] sm:$0x1] }
  0x89   :  { %52 = vst [vmem:[%s112_s1] sm:$0x1] %v50_v15 }

// kernel: encoder_forward.1
= control target key start
LH: loop header
LB: loop body
LE: loop exit
PB: predicated region body
PF: predicated region fallthrough
CT: control target
= control target key end

     0   :  { %12 = vsyncpa [#allocation4], 0  ;;  %v1991_v1 = vmov 0.0   ;;  %vm47_vm0 = vcmask 130048   ;;  %vm1992_vm1 = vmmov 0   ;;  %s2375_s0 = inlined_call_operand.vmem [shape: bf16[32,16], index: 0, kind: input, shape index: {}]   ;;  %s2376_s1 = inlined_call_operand.vmem [shape: bf16[16,128], index: 1, kind: input, shape index: {}]   ;;  %s2377_s2 = inlined_call_operand.vmem [shape: bf16[1,32,128], index: 2, kind: input, shape index: {}]   ;;  %s2378_s3 = inlined_call_operand.vmem [shape: bf16[2,32,128], index: 3, kind: input, shape index: {}]   ;;  %s2379_s4 = inlined_call_operand.vmem [shape: f32[2,1,128], index: 4, kind: input, shape index: {}]   ;;  %s2380_s5 = inlined_call_operand.hbm [shape: f32[2,4,32], index: 5, kind: output, shape index: {0}]   ;;  %s2381_s6 = inlined_call_operand.hbm [shape: f32[2,4,32], index: 6, kind: output, shape index: {1}]  }
   0x1   :  { %v1806_v0 = vld [vmem:[%s2376_s1] sm:$0xff]   ;;  %1661 = vmatprep.subr.bf16.mxu1 %v1991_v1  ;;  %v1809_v4 = vld [vmem:[%s2375_s0 + $0x8] sm:$0xff]   ;;  %1665 = vmatprep.mubr.msk.bf16.mxu1 %vm1992_vm1, %v1991_v1 }
   0x2   :  { %v2042_v2 = vld [vmem:[%s2378_s3] sm:$0xff]   ;;  %1655 = vmatprep.subr.bf16.mxu0 %v1806_v0  ;;  %v2055_v5 = vld [vmem:[%s2378_s3 + $0x8] sm:$0xff]  }
   0x3   :  { %v1808_v3 = vld [vmem:[%s2375_s0] sm:$0xff]   ;;  %1662 = vmatpush3.bf16.msra.mxu1 %v2042_v2  ;;  %1656 = vmatpush3.bf16.msra.mxu0 %v1806_v0 }
   0x4   :  { %1657 = vmatprep.mubr.msk.bf16.mxu0 %vm47_vm0, %v1808_v3  ;;  %1663 = vmatprep.subr.bf16.mxu1 %v1991_v1 }
   0x5   :  { %1669 = vmatprep.subr.bf16.mxu0 %v1991_v1 }
   0x6   :  { %1658 = vmatmul.mubr.msk.bf16.vlgmr.msra.gmra.mrb[0].mxu0 %vm47_vm0, %v1809_v4 }
   0x7   :  { %1664 = vmatpush3.bf16.msra.mxu1 %v2055_v5  ;;  %1670 = vmatpush3.bf16.msra.mxu0 %v2042_v2 }
   0x8   :  { %13 = vsyncpa [#allocation6], 0  ;;  %1671 = vmatprep.subr.bf16.mxu0 %v1991_v1  ;;  %1673 = vmatprep.mubr.msk.bf16.mxu0 %vm1992_vm1, %v1991_v1  ;;  %v1993_v6 = vmov 0   ;;  %v2084_v11 = vld [vmem:[%s2379_s4] ss:$0 sm:$0xff]  ;;  %s1994_s7 = smov 64  }
   0x9   :  { %1677 = vmatprep.subr.bf16.mxu1 %v1991_v1  ;;  %s1995_s8 = smov 32   ;;  %vm120_vm2 = vcmask 261120   ;;  %vm200_vm3 = vcmask 257024   ;;  %vm285_vm4 = vcmask 261124   ;;  %s1997_s17 = smov [#allocation5]  }
   0xa   :  { %1666 = vmatmul.mubr.bf16.vlgmr.msra.gmra.mrb[0].mxu1 %v1993_v6  ;;  %s1535_s18 = sshll.u32 %s1997_s17, 4  ;;  %s1536_s18 = int_to_ptr.vmem [resolvable:$true] %s1535_s18 }
   0xb   :  { %1672 = vmatpush3.bf16.msra.mxu0 %v2055_v5  ;;  %1678 = vmatpush3.bf16.msra.mxu1 %v2042_v2  ;;  %s1943_s19 = scalar_lea.vmem %s1536_s18, 128  ;;  %p1948_p1 = scmp.lt.s32.totalorder %s1536_s18, %s1536_s18 }
   0xc   :  { %1679 = vmatprep.subr.bf16.mxu1 %v1991_v1  ;;  %1681 = vmatprep.mubr.msk.bf16.mxu1 %vm1992_vm1, %v1991_v1  ;;  %p1944_p0 = scmp.ne.s32.totalorder %s1536_s18, %s1943_s19  ;;  %p1949_p2 = scmp.lt.s32.totalorder %s1943_s19, %s1943_s19 }
   0xd   :  { %1685 = vmatprep.subr.bf16.mxu0 %v1991_v1 }
   0xe   :  { %p1950_p3 = por %p1949_p2, %p1948_p1 }
   0xf   :  { %1680 = vmatpush3.bf16.msra.mxu1 %v2055_v5 }
  0x10   :  { %1693 = vmatprep.subr.bf16.mxu1 %v1991_v1  ;;  %p1951_p4 = pnand %p1950_p3, %p1944_p0 }
  0xd9   :  { %v2075_v7 = vpop.f32.mrb[0].mxu0 }
  0xda   :  { %v88_v8 = vpop.f32.mrb[1].mxu0 }
  0xdb   :  { %v2077_v9 = vpop.f32.mrb[2].mxu0 }
  0xdc   :  { %v2079_v10 = vpop.f32.mrb[3].mxu0 }
  0xdd   :  { %v158_v12 = vpop.f32.mrb[0].mxu1 }
  0xde   :  { %v164_v13 = vadd.f32 %v158_v12, %v88_v8  ;;  %v1667_v14 = vpop.f32.mrb[1].mxu1 }
  0xdf   :  { %v161_v15 = vpop.f32.mrb[2].mxu1 }
  0xe0   :  { %v171_v16 = vadd.f32 %v2084_v11, %v164_v13  ;;  %v1668_v17 = vpop.f32.mrb[3].mxu1 }
  0xe2   :  { %1815 = vtanh.f32 %v171_v16  ;;  %v1558_v19 = vmul.f32 -1.442695, %v171_v16 }
  0xe4   :  { %1817 = vpow2.f32 %v1558_v19 }
  0xec   :  { %v1816_v18 = vpop.eup %1815 }
  0xed   :  { %181 = vrot.lane.b32.xlu0 %v1816_v18, %s1994_s7 }
  0xee   :  { %v1818_v20 = vpop.eup %1817 }
  0xef   :  { %v175_v21 = vadd.f32 1.0, %v1818_v20 }
  0xf1   :  { %1819 = vrcp.f32 %v175_v21 }
  0xfb   :  { %v1820_v22 = vpop.eup %1819 }
  0xfc   :  { %v179_v25 = vmul.f32 0.0, %v1820_v22 }
 0x15f   :  { %v182_v23 = vpop.permute.xlu0 %181 }
 0x160   :  { %v184_v24 = vmul.f32 %v1820_v22, %v182_v23 }
 0x162   :  { %186 = vrot.lane.b32.xlu0 %v184_v24, %s1995_s8 }
 0x1d4   :  { %v187_v26 = vpop.permute.xlu0 %186 }
 0x1d5   :  { %v189_v27 = vadd.f32 %v187_v26, %v179_v25 }
 0x1d7   :  { %1821 = vtanh.f32 %v189_v27  ;;  %v262_v47 = vrot.slane %v189_v27, 4 }
 0x1e1   :  { %v1822_v28 = vpop.eup %1821 }
 0x1e2   :  { %192 = vrot.lane.b32.xlu1 %v1822_v28, %s1994_s7 }
 0x254   :  { %v193_v29 = vpop.permute.xlu1 %192 }
 0x255   :  { %v2090_v30 = vmul.f32 %v1820_v22, %v193_v29 }
 0x257   :  { %v202_v31 = vpack.c.bf16 %v2090_v30, %v2090_v30 }
 0x259   :  { %204 = vrot.lane.b32.xlu1 %v202_v31, %s1995_s8 }
 0x2cb   :  { %v205_v32 = vpop.permute.xlu1 %204 }
 0x2cc   :  { %1674 = vmatmul.mubr.msk.bf16.vlgmr.msra.gmra.mrb[4].mxu0 %vm120_vm2, %v205_v32 }
 0x2cd   :  { %1686 = vmatpush3.bf16.msra.mxu0 %v2042_v2  ;;  %1689 = vmatprep.mubr.msk.bf16.mxu0 %vm1992_vm1, %v1991_v1 }
 0x2ce   :  { %1687 = vmatprep.subr.bf16.mxu0 %v1991_v1 }
 0x2d1   :  { %1688 = vmatpush3.bf16.msra.mxu0 %v2055_v5 }
 0x2d2   :  { %1701 = vmatprep.subr.bf16.mxu0 %v1991_v1 }
 0x39f   :  { %v243_v33 = vpop.f32.mrb[4].mxu0 }
 0x3a0   :  { %v250_v34 = vrot.slane %v243_v33, 4  ;;  %v1675_v35 = vpop.f32.mrb[5].mxu0 }
 0x3a1   :  { %v246_v36 = vpop.f32.mrb[6].mxu0 }
 0x3a2   :  { %v252_v37 = vadd.f32 %v250_v34, %v88_v8  ;;  %v1676_v38 = vpop.f32.mrb[7].mxu0 }
 0x3a4   :  { %v253_v39 = vadd.f32 %v2084_v11, %v252_v37 }
 0x3a6   :  { %1823 = vtanh.f32 %v253_v39  ;;  %v1560_v41 = vmul.f32 -1.442695, %v253_v39 }
 0x3a8   :  { %1825 = vpow2.f32 %v1560_v41 }
 0x3b0   :  { %v1824_v40 = vpop.eup %1823 }
 0x3b1   :  { %266 = vrot.lane.b32.xlu0 %v1824_v40, %s1994_s7 }
 0x3b2   :  { %v1826_v42 = vpop.eup %1825 }
 0x3b3   :  { %v257_v43 = vadd.f32 1.0, %v1826_v42 }
 0x3b5   :  { %1827 = vrcp.f32 %v257_v43 }
 0x3bf   :  { %v1828_v44 = vpop.eup %1827 }
 0x3c0   :  { %v264_v48 = vmul.f32 %v1828_v44, %v262_v47 }
 0x423   :  { %v267_v45 = vpop.permute.xlu0 %266 }
 0x424   :  { %v269_v46 = vmul.f32 %v1828_v44, %v267_v45 }
 0x426   :  { %271 = vrot.lane.b32.xlu1 %v269_v46, %s1995_s8 }
 0x498   :  { %v272_v49 = vpop.permute.xlu1 %271 }
 0x499   :  { %v274_v50 = vadd.f32 %v272_v49, %v264_v48 }
 0x49b   :  { %1829 = vtanh.f32 %v274_v50  ;;  %v345_v14 = vrot.slane %v274_v50, 4 }
 0x4a5   :  { %v1830_v51 = vpop.eup %1829 }
 0x4a6   :  { %277 = vrot.lane.b32.xlu0 %v1830_v51, %s1994_s7 }
 0x518   :  { %v278_v52 = vpop.permute.xlu0 %277 }
 0x519   :  { %v2106_v53 = vmul.f32 %v1828_v44, %v278_v52 }
 0x51b   :  { %v287_v54 = vpack.c.bf16 %v2106_v53, %v2106_v53 }
 0x51d   :  { %v289_v55 = vrot.slane %v287_v54, 2 }
 0x51f   :  { %290 = vrot.lane.b32.xlu1 %v289_v55, %s1995_s8 }
 0x591   :  { %v291_v56 = vpop.permute.xlu1 %290 }
 0x592   :  { %1682 = vmatmul.mubr.msk.bf16.vlgmr.msra.gmra.mrb[4].mxu1 %vm120_vm2, %v291_v56 }
 0x593   :  { %1694 = vmatpush3.bf16.msra.mxu1 %v2042_v2  ;;  %1697 = vmatprep.mubr.msk.bf16.mxu1 %vm1992_vm1, %v1991_v1 }
 0x594   :  { %1695 = vmatprep.subr.bf16.mxu1 %v1991_v1 }
 0x597   :  { %1696 = vmatpush3.bf16.msra.mxu1 %v2055_v5 }
 0x598   :  { %1709 = vmatprep.subr.bf16.mxu1 %v1991_v1 }
 0x665   :  { %v329_v57 = vpop.f32.mrb[4].mxu1 }
 0x666   :  { %v335_v58 = vadd.f32 %v329_v57, %v2079_v10  ;;  %v1683_v59 = vpop.f32.mrb[5].mxu1 }
 0x667   :  { %v332_v60 = vpop.f32.mrb[6].mxu1 }
 0x668   :  { %v336_v61 = vadd.f32 %v2084_v11, %v335_v58  ;;  %v1684_v62 = vpop.f32.mrb[7].mxu1 }
 0x66a   :  { %1831 = vtanh.f32 %v336_v61  ;;  %v1562_v0 = vmul.f32 -1.442695, %v336_v61 }
 0x66c   :  { %1833 = vpow2.f32 %v1562_v0 }
 0x674   :  { %v1832_v63 = vpop.eup %1831 }
 0x675   :  { %349 = vrot.lane.b32.xlu0 %v1832_v63, %s1994_s7 }
 0x676   :  { %v1834_v3 = vpop.eup %1833 }
 0x677   :  { %v340_v4 = vadd.f32 1.0, %v1834_v3 }
 0x679   :  { %1835 = vrcp.f32 %v340_v4 }
 0x683   :  { %v1836_v8 = vpop.eup %1835 }
 0x684   :  { %v347_v15 = vmul.f32 %v1836_v8, %v345_v14 }
 0x6e7   :  { %v350_v12 = vpop.permute.xlu0 %349 }
 0x6e8   :  { %v352_v13 = vmul.f32 %v1836_v8, %v350_v12 }
 0x6ea   :  { %354 = vrot.lane.b32.xlu1 %v352_v13, %s1995_s8 }
 0x75c   :  { %v355_v16 = vpop.permute.xlu1 %354 }
 0x75d   :  { %v357_v17 = vadd.f32 %v355_v16, %v347_v15 }
 0x75f   :  { %1837 = vtanh.f32 %v357_v17  ;;  %v429_v38 = vrot.slane %v357_v17, 4 }
 0x769   :  { %v1838_v18 = vpop.eup %1837 }
 0x76a   :  { %360 = vrot.lane.b32.xlu0 %v1838_v18, %s1994_s7 }
 0x7dc   :  { %v361_v19 = vpop.permute.xlu0 %360 }
 0x7dd   :  { %v2123_v20 = vmul.f32 %v1836_v8, %v361_v19 }
 0x7df   :  { %v369_v21 = vpack.c.bf16 %v2123_v20, %v2123_v20 }
 0x7e1   :  { %371 = vrot.lane.b32.xlu1 %v369_v21, %s1995_s8 }
 0x853   :  { %v372_v22 = vpop.permute.xlu1 %371 }
 0x854   :  { %1690 = vmatmul.mubr.msk.bf16.vlgmr.msra.gmra.mrb[8].mxu0 %vm120_vm2, %v372_v22 }
 0x855   :  { %1702 = vmatpush3.bf16.msra.mxu0 %v2042_v2  ;;  %1705 = vmatprep.mubr.msk.bf16.mxu0 %vm1992_vm1, %v1991_v1 }
 0x856   :  { %1703 = vmatprep.subr.bf16.mxu0 %v1991_v1 }
 0x859   :  { %1704 = vmatpush3.bf16.msra.mxu0 %v2055_v5 }
 0x85a   :  { %1717 = vmatprep.subr.bf16.mxu0 %v1991_v1 }
 0x927   :  { %v410_v23 = vpop.f32.mrb[8].mxu0 }
 0x928   :  { %v417_v24 = vrot.slane %v410_v23, 4  ;;  %v1691_v25 = vpop.f32.mrb[9].mxu0 }
 0x929   :  { %v413_v26 = vpop.f32.mrb[10].mxu0 }
 0x92a   :  { %v419_v27 = vadd.f32 %v417_v24, %v2079_v10  ;;  %v1692_v28 = vpop.f32.mrb[11].mxu0 }
 0x92c   :  { %v420_v29 = vadd.f32 %v2084_v11, %v419_v27 }
 0x92e   :  { %1839 = vtanh.f32 %v420_v29  ;;  %v1564_v32 = vmul.f32 -1.442695, %v420_v29 }
 0x930   :  { %1841 = vpow2.f32 %v1564_v32 }
 0x938   :  { %v1840_v31 = vpop.eup %1839 }
 0x939   :  { %433 = vrot.lane.b32.xlu0 %v1840_v31, %s1994_s7 }
 0x93a   :  { %v1842_v33 = vpop.eup %1841 }
 0x93b   :  { %v424_v34 = vadd.f32 1.0, %v1842_v33 }
 0x93d   :  { %1843 = vrcp.f32 %v424_v34 }
 0x947   :  { %v1844_v35 = vpop.eup %1843 }
 0x948   :  { %v431_v39 = vmul.f32 %v1844_v35, %v429_v38 }
 0x9ab   :  { %v434_v36 = vpop.permute.xlu0 %433 }
 0x9ac   :  { %v436_v37 = vmul.f32 %v1844_v35, %v434_v36 }
 0x9ae   :  { %438 = vrot.lane.b32.xlu1 %v436_v37, %s1995_s8 }
 0xa20   :  { %v439_v10 = vpop.permute.xlu1 %438 }
 0xa21   :  { %v441_v40 = vadd.f32 %v439_v10, %v431_v39 }
 0xa23   :  { %1845 = vtanh.f32 %v441_v40  ;;  %v511_v61 = vrot.slane %v441_v40, 4 }
 0xa2d   :  { %v1846_v41 = vpop.eup %1845 }
 0xa2e   :  { %444 = vrot.lane.b32.xlu0 %v1846_v41, %s1994_s7 }
 0xaa0   :  { %v445_v42 = vpop.permute.xlu0 %444 }
 0xaa1   :  { %v2140_v43 = vmul.f32 %v1844_v35, %v445_v42 }
 0xaa3   :  { %v453_v44 = vpack.c.bf16 %v2140_v43, %v2140_v43 }
 0xaa5   :  { %v455_v45 = vrot.slane %v453_v44, 2 }
 0xaa7   :  { %456 = vrot.lane.b32.xlu1 %v455_v45, %s1995_s8 }
 0xb19   :  { %v457_v46 = vpop.permute.xlu1 %456 }
 0xb1a   :  { %1698 = vmatmul.mubr.msk.bf16.vlgmr.msra.gmra.mrb[8].mxu1 %vm120_vm2, %v457_v46 }
 0xb1b   :  { %1710 = vmatpush3.bf16.msra.mxu1 %v2042_v2  ;;  %1713 = vmatprep.mubr.msk.bf16.mxu1 %vm1992_vm1, %v1991_v1 }
 0xb1c   :  { %1711 = vmatprep.subr.bf16.mxu1 %v1991_v1 }
 0xb1f   :  { %1712 = vmatpush3.bf16.msra.mxu1 %v2055_v5 }
 0xbed   :  { %v495_v47 = vpop.f32.mrb[8].mxu1 }
 0xbee   :  { %v501_v48 = vadd.f32 %v2075_v7, %v495_v47  ;;  %v1699_v49 = vpop.f32.mrb[9].mxu1 }
 0xbef   :  { %v498_v50 = vpop.f32.mrb[10].mxu1 }
 0xbf0   :  { %v502_v51 = vadd.f32 %v2084_v11, %v501_v48  ;;  %v1700_v52 = vpop.f32.mrb[11].mxu1 }
 0xbf2   :  { %1847 = vtanh.f32 %v502_v51  ;;  %v1566_v55 = vmul.f32 -1.442695, %v502_v51 }
 0xbf4   :  { %1849 = vpow2.f32 %v1566_v55 }
 0xbfc   :  { %v1848_v54 = vpop.eup %1847 }
 0xbfd   :  { %515 = vrot.lane.b32.xlu0 %v1848_v54, %s1994_s7 }
 0xbfe   :  { %v1850_v56 = vpop.eup %1849 }
 0xbff   :  { %v506_v57 = vadd.f32 1.0, %v1850_v56 }
 0xc01   :  { %1851 = vrcp.f32 %v506_v57 }
 0xc0b   :  { %v1852_v58 = vpop.eup %1851 }
 0xc0c   :  { %v513_v62 = vmul.f32 %v1852_v58, %v511_v61 }
 0xc6f   :  { %v516_v59 = vpop.permute.xlu0 %515 }
 0xc70   :  { %v518_v60 = vmul.f32 %v1852_v58, %v516_v59 }
 0xc72   :  { %520 = vrot.lane.b32.xlu1 %v518_v60, %s1995_s8 }
 0xce4   :  { %v521_v63 = vpop.permute.xlu1 %520 }
 0xce5   :  { %v523_v0 = vadd.f32 %v521_v63, %v513_v62 }
 0xce7   :  { %1853 = vtanh.f32 %v523_v0  ;;  %v595_v27 = vrot.slane %v523_v0, 4 }
 0xcf1   :  { %v1854_v3 = vpop.eup %1853 }
 0xcf2   :  { %526 = vrot.lane.b32.xlu0 %v1854_v3, %s1994_s7 }
 0xd64   :  { %v527_v4 = vpop.permute.xlu0 %526 }
 0xd65   :  { %v2156_v8 = vmul.f32 %v1852_v58, %v527_v4 }
 0xd67   :  { %v535_v12 = vpack.c.bf16 %v2156_v8, %v2156_v8 }
 0xd69   :  { %537 = vrot.lane.b32.xlu1 %v535_v12, %s1995_s8 }
 0xddb   :  { %v538_v13 = vpop.permute.xlu1 %537 }
 0xddc   :  { %1706 = vmatmul.mubr.msk.bf16.vlgmr.msra.gmra.mrb[12].mxu0 %vm120_vm2, %v538_v13 }
 0xddd   :  { %1718 = vmatpush3.bf16.msra.mxu0 %v2042_v2  ;;  %1721 = vmatprep.mubr.msk.bf16.mxu0 %vm1992_vm1, %v1991_v1 }
 0xdde   :  { %1719 = vmatprep.subr.bf16.mxu0 %v1991_v1 }
 0xde1   :  { %1720 = vmatpush3.bf16.msra.mxu0 %v2055_v5 }
 0xde2   :  { %1733 = vmatprep.subr.bf16.mxu0 %v1991_v1 }
 0xeaf   :  { %v576_v14 = vpop.f32.mrb[12].mxu0 }
 0xeb0   :  { %v583_v15 = vrot.slane %v576_v14, 4  ;;  %v1707_v16 = vpop.f32.mrb[13].mxu0 }
 0xeb1   :  { %v579_v17 = vpop.f32.mrb[14].mxu0 }
 0xeb2   :  { %v585_v18 = vadd.f32 %v2075_v7, %v583_v15  ;;  %v1708_v19 = vpop.f32.mrb[15].mxu0 }
 0xeb4   :  { %v586_v21 = vadd.f32 %v2084_v11, %v585_v18 }
 0xeb6   :  { %1855 = vtanh.f32 %v586_v21  ;;  %v1568_v22 = vmul.f32 -1.442695, %v586_v21 }
 0xeb8   :  { %1857 = vpow2.f32 %v1568_v22 }
 0xec0   :  { %v1856_v2 = vpop.eup %1855 }
 0xec1   :  { %599 = vrot.lane.b32.xlu0 %v1856_v2, %s1994_s7 }
 0xec2   :  { %v1858_v23 = vpop.eup %1857 }
 0xec3   :  { %v590_v24 = vadd.f32 1.0, %v1858_v23 }
 0xec5   :  { %1859 = vrcp.f32 %v590_v24  ;;  %v1811_v24 = vld [vmem:[%s2377_s2] sm:$0xff]  }
 0xec6   :  { %1725 = vmatprep.subr.bf16.mxu1 %v1811_v24 }
 0xecf   :  { %v1860_v5 = vpop.eup %1859 }
 0xed0   :  { %v597_v28 = vmul.f32 %v1860_v5, %v595_v27 }
 0xf33   :  { %v600_v25 = vpop.permute.xlu0 %599 }
 0xf34   :  { %v602_v26 = vmul.f32 %v1860_v5, %v600_v25 }
 0xf36   :  { %604 = vrot.lane.b32.xlu1 %v602_v26, %s1995_s8 }
 0xfa8   :  { %v605_v7 = vpop.permute.xlu1 %604 }
 0xfa9   :  { %v607_v29 = vadd.f32 %v605_v7, %v597_v28 }
 0xfab   :  { %1861 = vtanh.f32 %v607_v29  ;;  %v677_v50 = vrot.slane %v607_v29, 4 }
 0xfb5   :  { %v1862_v31 = vpop.eup %1861 }
 0xfb6   :  { %610 = vrot.lane.b32.xlu0 %v1862_v31, %s1994_s7 }
0x1028   :  { %v611_v32 = vpop.permute.xlu0 %610 }
0x1029   :  { %v2173_v33 = vmul.f32 %v1860_v5, %v611_v32  ;;  %v1813_v5 = vld [vmem:[%s2377_s2 + $0x8] sm:$0xff]  }
0x102b   :  { %v619_v34 = vpack.c.bf16 %v2173_v33, %v2173_v33 }
0x102d   :  { %v621_v35 = vrot.slane %v619_v34, 2 }
0x102f   :  { %622 = vrot.lane.b32.xlu1 %v621_v35, %s1995_s8 }
0x10a1   :  { %v623_v36 = vpop.permute.xlu1 %622 }
0x10a2   :  { %1714 = vmatmul.mubr.msk.bf16.vlgmr.msra.gmra.mrb[12].mxu1 %vm120_vm2, %v623_v36 }
0x10a3   :  { %1726 = vmatpush3.bf16.msra.mxu1 %v1811_v24 }
0x10a4   :  { %1727 = vmatprep.subr.bf16.mxu1 %v1813_v5 }
0x10a7   :  { %1728 = vmatpush3.bf16.msra.mxu1 %v1813_v5 }
0x10a8   :  { %1741 = vmatprep.subr.bf16.mxu1 %v1991_v1 }
0x1175   :  { %v661_v37 = vpop.f32.mrb[12].mxu1 }
0x1176   :  { %v667_v38 = vadd.f32 %v2077_v9, %v661_v37  ;;  %v1715_v39 = vpop.f32.mrb[13].mxu1 }
0x1177   :  { %v664_v10 = vpop.f32.mrb[14].mxu1 }
0x1178   :  { %v668_v40 = vadd.f32 %v2084_v11, %v667_v38  ;;  %v1716_v41 = vpop.f32.mrb[15].mxu1 }
0x117a   :  { %1863 = vtanh.f32 %v668_v40  ;;  %v1570_v44 = vmul.f32 -1.442695, %v668_v40  ;;  %v2256_v40 = vld [vmem:[%s2379_s4 + $0x1] ss:$0 sm:$0xff]  ;;  %s1996_s4 = smov 96  }
0x117c   :  { %1865 = vpow2.f32 %v1570_v44 }
0x1184   :  { %v1864_v42 = vpop.eup %1863 }
0x1185   :  { %681 = vrot.lane.b32.xlu0 %v1864_v42, %s1994_s7 }
0x1186   :  { %v1866_v45 = vpop.eup %1865 }
0x1187   :  { %v672_v46 = vadd.f32 1.0, %v1866_v45 }
0x1189   :  { %1867 = vrcp.f32 %v672_v46 }
0x1193   :  { %v1868_v47 = vpop.eup %1867 }
0x1194   :  { %v679_v51 = vmul.f32 %v1868_v47, %v677_v50 }
0x11f7   :  { %v682_v48 = vpop.permute.xlu0 %681 }
0x11f8   :  { %v684_v49 = vmul.f32 %v1868_v47, %v682_v48 }
0x11fa   :  { %686 = vrot.lane.b32.xlu1 %v684_v49, %s1995_s8 }
0x126c   :  { %v687_v52 = vpop.permute.xlu1 %686 }
0x126d   :  { %v689_v54 = vadd.f32 %v687_v52, %v679_v51 }
0x126f   :  { %1869 = vtanh.f32 %v689_v54 }
0x1279   :  { %v1870_v55 = vpop.eup %1869 }
0x127a   :  { %692 = vrot.lane.b32.xlu0 %v1870_v55, %s1994_s7 }
0x12ec   :  { %v693_v56 = vpop.permute.xlu0 %692 }
0x12ed   :  { %v695_v57 = vmul.f32 %v1868_v47, %v693_v56 }
0x12ef   :  { %v701_v58 = vpack.c.bf16 %v695_v57, %v695_v57 }
0x12f1   :  { %703 = vrot.lane.b32.xlu1 %v701_v58, %s1995_s8 }
0x1363   :  { %v704_v59 = vpop.permute.xlu1 %703 }
0x1364   :  { %1722 = vmatmul.mubr.msk.bf16.vlgmr.msra.gmra.mrb[16].mxu0 %vm120_vm2, %v704_v59 }
0x1365   :  { %1737 = vmatprep.mubr.msk.bf16.mxu0 %vm1992_vm1, %v1991_v1 }
0x1437   :  { %v742_v60 = vpop.f32.mrb[16].mxu0 }
0x1438   :  { %v749_v61 = vrot.slane %v742_v60, 4  ;;  %v1723_v62 = vpop.f32.mrb[17].mxu0 }
0x1439   :  { %v745_v63 = vpop.f32.mrb[18].mxu0 }
0x143a   :  { %v751_v0 = vadd.f32 %v2077_v9, %v749_v61  ;;  %v1724_v3 = vpop.f32.mrb[19].mxu0  ;;  %v761_v9 = vrot.slane %v689_v54, 4 }
0x143c   :  { %v752_v4 = vadd.f32 %v2084_v11, %v751_v0 }
0x143e   :  { %1871 = vtanh.f32 %v752_v4  ;;  %v1572_v13 = vmul.f32 -1.442695, %v752_v4 }
0x1440   :  { %1873 = vpow2.f32 %v1572_v13 }
0x1448   :  { %v1872_v12 = vpop.eup %1871 }
0x1449   :  { %765 = vrot.lane.b32.xlu0 %v1872_v12, %s1994_s7 }
0x144a   :  { %v1874_v14 = vpop.eup %1873 }
0x144b   :  { %v756_v15 = vadd.f32 1.0, %v1874_v14 }
0x144d   :  { %1875 = vrcp.f32 %v756_v15 }
0x1457   :  { %v1876_v16 = vpop.eup %1875 }
0x1458   :  { %v763_v11 = vmul.f32 %v1876_v16, %v761_v9 }
0x14bb   :  { %v766_v17 = vpop.permute.xlu0 %765 }
0x14bc   :  { %v768_v18 = vmul.f32 %v1876_v16, %v766_v17 }
0x14be   :  { %770 = vrot.lane.b32.xlu1 %v768_v18, %s1995_s8 }
0x14c2   :  { %197 = vrot.lane.b32.xlu1 %v2090_v30, %s1995_s8 }
0x14c6   :  { %365 = vrot.lane.b32.xlu1 %v2123_v20, %s1995_s8 }
0x14ca   :  { %531 = vrot.lane.b32.xlu1 %v2156_v8, %s1995_s8  ;;  %v2212_v8 = vld [vmem:[%s2378_s3 + $0x10] sm:$0xff]  }
0x14cb   :  { %1734 = vmatpush3.bf16.msra.mxu0 %v2212_v8 }
0x14cc   :  { %1735 = vmatprep.subr.bf16.mxu0 %v1991_v1 }
0x14ce   :  { %697 = vrot.lane.b32.xlu1 %v695_v57, %s1995_s8 }
0x1530   :  { %v771_v19 = vpop.permute.xlu1 %770 }
0x1531   :  { %v2199_v21 = vadd.f32 %v771_v19, %v763_v11 }
0x1533   :  { %1877 = vtanh.f32 %v2199_v21 }
0x1534   :  { %v198_v2 = vpop.permute.xlu1 %197 }
0x1535   :  { %201 = vst.msk [vmem:[#allocation2] sm:$0xf] %vm200_vm3, %v198_v2 }
0x1538   :  { %v366_v22 = vpop.permute.xlu1 %365 }
0x1539   :  { %368 = vst.msk [vmem:[#allocation2 + $0x8] sm:$0xf] %vm200_vm3, %v366_v22 }
0x153c   :  { %v532_v30 = vpop.permute.xlu1 %531 }
0x153d   :  { %v1878_v23 = vpop.eup %1877  ;;  %534 = vst.msk [vmem:[#allocation2 + $0x10] sm:$0xf] %vm200_vm3, %v532_v30 }
0x153e   :  { %776 = vrot.lane.b32.xlu0 %v1878_v23, %s1994_s7 }
0x1540   :  { %v698_v20 = vpop.permute.xlu1 %697 }
0x1541   :  { %700 = vst.msk [vmem:[#allocation2 + $0x18] sm:$0xf] %vm200_vm3, %v698_v20 }
0x1542   :  { %282 = vrot.lane.b32.xlu0 %v2106_v53, %s1995_s8  ;;  %v2224_v53 = vld [vmem:[%s2378_s3 + $0x18] sm:$0xff]  }
0x1543   :  { %1736 = vmatpush3.bf16.msra.mxu0 %v2224_v53 }
0x1544   :  { %1749 = vmatprep.subr.bf16.mxu0 %v1991_v1 }
0x1546   :  { %449 = vrot.lane.b32.xlu0 %v2140_v43, %s1995_s8  ;;  %1738 = vmatmul.mubr.bf16.vlgmr.msra.gmra.mrb[20].mxu0 %v1993_v6 }
0x1547   :  { %1750 = vmatpush3.bf16.msra.mxu0 %v2212_v8  ;;  %1753 = vmatprep.mubr.msk.bf16.mxu0 %vm1992_vm1, %v1991_v1 }
0x1548   :  { %1751 = vmatprep.subr.bf16.mxu0 %v1991_v1 }
0x154a   :  { %615 = vrot.lane.b32.xlu0 %v2173_v33, %s1995_s8 }
0x154b   :  { %1752 = vmatpush3.bf16.msra.mxu0 %v2224_v53 }
0x154c   :  { %1765 = vmatprep.subr.bf16.mxu0 %v1991_v1 }
0x15b0   :  { %v777_v43 = vpop.permute.xlu0 %776 }
0x15b1   :  { %v779_v25 = vmul.f32 %v1876_v16, %v777_v43 }
0x15b3   :  { %781 = vrot.lane.b32.xlu0 %v779_v25, %s1995_s8 }
0x15b4   :  { %v283_v26 = vpop.permute.xlu0 %282 }
0x15b5   :  { %286 = vst.msk [vmem:[#allocation2] sm:$0xf0] %vm285_vm4, %v283_v26 }
0x15b8   :  { %v450_v6 = vpop.permute.xlu0 %449 }
0x15b9   :  { %452 = vst.msk [vmem:[#allocation2 + $0x8] sm:$0xf0] %vm285_vm4, %v450_v6 }
0x15bc   :  { %v616_v27 = vpop.permute.xlu0 %615  ;;  %v791_v28 = vld [vmem:[#allocation2] sm:$0xff] }
0x15bd   :  { %618 = vst.msk [vmem:[#allocation2 + $0x10] sm:$0xf0] %vm285_vm4, %v616_v27 }
0x15c0   :  { %v792_v7 = vld [vmem:[#allocation2 + $0x8] sm:$0xff] }
0x15c1   :  { %v795_v29 = vpack.c.bf16 %v792_v7, %v791_v28 }
0x15c3   :  { %1729 = vmatprep.mubr.msk.bf16.mxu1 %vm120_vm2, %v795_v29 }
0x15c4   :  { %v793_v32 = vld [vmem:[#allocation2 + $0x10] sm:$0xff] }
0x1619   :  { %v921_v35 = vpop.f32.mrb[20].mxu0 }
0x161a   :  { %v1739_v36 = vpop.f32.mrb[21].mxu0 }
0x161b   :  { %v924_v37 = vpop.f32.mrb[22].mxu0 }
0x161c   :  { %v1740_v38 = vpop.f32.mrb[23].mxu0 }
0x1625   :  { %v782_v31 = vpop.permute.xlu0 %781 }
0x1626   :  { %784 = vst.msk [vmem:[#allocation2 + $0x18] sm:$0xf0] %vm285_vm4, %v782_v31  ;;  %785 = vst.msk [vmem:[#allocation3 - $0x4] sm:$0xf0] %vm285_vm4, %v782_v31 }
0x162d   :  { %v794_v33 = vld [vmem:[#allocation2 + $0x18] sm:$0xff] }
0x162e   :  { %v796_v34 = vpack.c.bf16 %v794_v33, %v793_v32 }
0x1630   :  { %1730 = vmatmul.mubr.msk.bf16.vlgmr.msra.gmra.mrb[16].mxu1 %vm120_vm2, %v796_v34 }
0x1631   :  { %1742 = vmatpush3.bf16.msra.mxu1 %v2212_v8  ;;  %1745 = vmatprep.mubr.msk.bf16.mxu1 %vm1992_vm1, %v1991_v1 }
0x1632   :  { %1743 = vmatprep.subr.bf16.mxu1 %v1991_v1 }
0x1635   :  { %1744 = vmatpush3.bf16.msra.mxu1 %v2224_v53 }
0x1636   :  { %1757 = vmatprep.subr.bf16.mxu1 %v1991_v1 }
0x1703   :  { %v2251_v39 = vpop.f32.mrb[16].mxu1 }
0x1704   :  { %v853_v10 = vpop.f32.mrb[17].mxu1 }
0x1705   :  { %v927_v41 = vadd.f32 %v921_v35, %v853_v10  ;;  %v2258_v42 = vpop.f32.mrb[18].mxu1 }
0x1706   :  { %v2260_v44 = vpop.f32.mrb[19].mxu1 }
0x1707   :  { %v934_v45 = vadd.f32 %v2256_v40, %v927_v41 }
0x1709   :  { %1879 = vtanh.f32 %v934_v45  ;;  %v1585_v47 = vmul.f32 -1.442695, %v934_v45 }
0x170b   :  { %1881 = vpow2.f32 %v1585_v47 }
0x1713   :  { %v1880_v46 = vpop.eup %1879 }
0x1714   :  { %944 = vrot.lane.b32.xlu1 %v1880_v46, %s1994_s7 }
0x1715   :  { %v1882_v48 = vpop.eup %1881 }
0x1716   :  { %v938_v49 = vadd.f32 1.0, %v1882_v48 }
0x1718   :  { %1883 = vrcp.f32 %v938_v49 }
0x1722   :  { %v1884_v50 = vpop.eup %1883 }
0x1723   :  { %v942_v54 = vmul.f32 0.0, %v1884_v50 }
0x1786   :  { %v945_v51 = vpop.permute.xlu1 %944 }
0x1787   :  { %v947_v52 = vmul.f32 %v1884_v50, %v945_v51 }
0x1789   :  { %949 = vrot.lane.b32.xlu0 %v947_v52, %s1995_s8 }
0x17fb   :  { %v950_v55 = vpop.permute.xlu0 %949 }
0x17fc   :  { %v952_v56 = vadd.f32 %v950_v55, %v942_v54 }
0x17fe   :  { %1885 = vtanh.f32 %v952_v56  ;;  %v1019_v19 = vrot.slane %v952_v56, 4 }
0x1808   :  { %v1886_v57 = vpop.eup %1885 }
0x1809   :  { %955 = vrot.lane.b32.xlu1 %v1886_v57, %s1994_s7 }
0x187b   :  { %v956_v58 = vpop.permute.xlu1 %955 }
0x187c   :  { %v958_v59 = vmul.f32 %v1884_v50, %v956_v58 }
0x187e   :  { %v959_v60 = vpack.c.bf16 %v958_v59, %v958_v59 }
0x1880   :  { %961 = vrot.lane.b32.xlu0 %v959_v60, %s1995_s8 }
0x18f2   :  { %v962_v61 = vpop.permute.xlu0 %961 }
0x18f3   :  { %1746 = vmatmul.mubr.msk.bf16.vlgmr.msra.gmra.mrb[20].mxu1 %vm120_vm2, %v962_v61 }
0x18f4   :  { %1758 = vmatpush3.bf16.msra.mxu1 %v2212_v8  ;;  %1761 = vmatprep.mubr.msk.bf16.mxu1 %vm1992_vm1, %v1991_v1 }
0x18f5   :  { %1759 = vmatprep.subr.bf16.mxu1 %v1991_v1 }
0x18f8   :  { %1760 = vmatpush3.bf16.msra.mxu1 %v2224_v53 }
0x18f9   :  { %1773 = vmatprep.subr.bf16.mxu1 %v1991_v1 }
0x19c6   :  { %v1000_v62 = vpop.f32.mrb[20].mxu1 }
0x19c7   :  { %v1007_v63 = vrot.slane %v1000_v62, 4  ;;  %v1747_v0 = vpop.f32.mrb[21].mxu1 }
0x19c8   :  { %v1003_v3 = vpop.f32.mrb[22].mxu1 }
0x19c9   :  { %v1009_v4 = vadd.f32 %v1007_v63, %v853_v10  ;;  %v1748_v12 = vpop.f32.mrb[23].mxu1 }
0x19cb   :  { %v1010_v13 = vadd.f32 %v2256_v40, %v1009_v4 }
0x19cd   :  { %1887 = vtanh.f32 %v1010_v13  ;;  %v1587_v15 = vmul.f32 -1.442695, %v1010_v13 }
0x19cf   :  { %1889 = vpow2.f32 %v1587_v15 }
0x19d7   :  { %v1888_v14 = vpop.eup %1887 }
0x19d8   :  { %1023 = vrot.lane.b32.xlu1 %v1888_v14, %s1994_s7 }
0x19d9   :  { %v1890_v16 = vpop.eup %1889 }
0x19da   :  { %v1014_v17 = vadd.f32 1.0, %v1890_v16 }
0x19dc   :  { %1891 = vrcp.f32 %v1014_v17 }
0x19e6   :  { %v1892_v18 = vpop.eup %1891 }
0x19e7   :  { %v1021_v2 = vmul.f32 %v1892_v18, %v1019_v19 }
0x1a4a   :  { %v1024_v9 = vpop.permute.xlu1 %1023 }
0x1a4b   :  { %v1026_v11 = vmul.f32 %v1892_v18, %v1024_v9 }
0x1a4d   :  { %1028 = vrot.lane.b32.xlu0 %v1026_v11, %s1995_s8 }
0x1abf   :  { %v1029_v22 = vpop.permute.xlu0 %1028 }
0x1ac0   :  { %v1031_v30 = vadd.f32 %v1029_v22, %v1021_v2 }
0x1ac2   :  { %1893 = vtanh.f32 %v1031_v30  ;;  %v1096_v38 = vrot.slane %v1031_v30, 4 }
0x1acc   :  { %v1894_v23 = vpop.eup %1893 }
0x1acd   :  { %1034 = vrot.lane.b32.xlu1 %v1894_v23, %s1994_s7 }
0x1b3f   :  { %v1035_v20 = vpop.permute.xlu1 %1034 }
0x1b40   :  { %v1037_v24 = vmul.f32 %v1892_v18, %v1035_v20 }
0x1b42   :  { %v1038_v5 = vpack.c.bf16 %v1037_v24, %v1037_v24 }
0x1b44   :  { %v1040_v43 = vrot.slane %v1038_v5, 2 }
0x1b46   :  { %1041 = vrot.lane.b32.xlu0 %v1040_v43, %s1995_s8 }
0x1bb8   :  { %v1042_v25 = vpop.permute.xlu0 %1041 }
0x1bb9   :  { %1754 = vmatmul.mubr.msk.bf16.vlgmr.msra.gmra.mrb[24].mxu0 %vm120_vm2, %v1042_v25 }
0x1bba   :  { %1766 = vmatpush3.bf16.msra.mxu0 %v2212_v8  ;;  %1769 = vmatprep.mubr.msk.bf16.mxu0 %vm1992_vm1, %v1991_v1 }
0x1bbb   :  { %1767 = vmatprep.subr.bf16.mxu0 %v1991_v1 }
0x1bbe   :  { %1768 = vmatpush3.bf16.msra.mxu0 %v2224_v53 }
0x1bbf   :  { %1781 = vmatprep.subr.bf16.mxu0 %v1991_v1 }
0x1c8c   :  { %v1080_v26 = vpop.f32.mrb[24].mxu0 }
0x1c8d   :  { %v1086_v6 = vadd.f32 %v1080_v26, %v2260_v44  ;;  %v1755_v27 = vpop.f32.mrb[25].mxu0 }
0x1c8e   :  { %v1083_v28 = vpop.f32.mrb[26].mxu0 }
0x1c8f   :  { %v1087_v7 = vadd.f32 %v2256_v40, %v1086_v6  ;;  %v1756_v29 = vpop.f32.mrb[27].mxu0 }
0x1c91   :  { %1895 = vtanh.f32 %v1087_v7  ;;  %v1589_v32 = vmul.f32 -1.442695, %v1087_v7 }
0x1c93   :  { %1897 = vpow2.f32 %v1589_v32 }
0x1c9b   :  { %v1896_v31 = vpop.eup %1895 }
0x1c9c   :  { %1100 = vrot.lane.b32.xlu1 %v1896_v31, %s1994_s7 }
0x1c9d   :  { %v1898_v33 = vpop.eup %1897 }
0x1c9e   :  { %v1091_v34 = vadd.f32 1.0, %v1898_v33 }
0x1ca0   :  { %1899 = vrcp.f32 %v1091_v34 }
0x1caa   :  { %v1900_v35 = vpop.eup %1899 }
0x1cab   :  { %v1098_v10 = vmul.f32 %v1900_v35, %v1096_v38 }
0x1d0e   :  { %v1101_v36 = vpop.permute.xlu1 %1100 }
0x1d0f   :  { %v1103_v37 = vmul.f32 %v1900_v35, %v1101_v36 }
0x1d11   :  { %1105 = vrot.lane.b32.xlu0 %v1103_v37, %s1995_s8 }
0x1d83   :  { %v1106_v41 = vpop.permute.xlu0 %1105 }
0x1d84   :  { %v1108_v45 = vadd.f32 %v1106_v41, %v1098_v10 }
0x1d86   :  { %1901 = vtanh.f32 %v1108_v45  ;;  %v1175_v4 = vrot.slane %v1108_v45, 4 }
0x1d90   :  { %v1902_v46 = vpop.eup %1901 }
0x1d91   :  { %1111 = vrot.lane.b32.xlu1 %v1902_v46, %s1994_s7 }
0x1e03   :  { %v1112_v47 = vpop.permute.xlu1 %1111 }
0x1e04   :  { %v1114_v48 = vmul.f32 %v1900_v35, %v1112_v47 }
0x1e06   :  { %v1115_v49 = vpack.c.bf16 %v1114_v48, %v1114_v48 }
0x1e08   :  { %1117 = vrot.lane.b32.xlu0 %v1115_v49, %s1995_s8 }
0x1e7a   :  { %v1118_v50 = vpop.permute.xlu0 %1117 }
0x1e7b   :  { %1762 = vmatmul.mubr.msk.bf16.vlgmr.msra.gmra.mrb[24].mxu1 %vm120_vm2, %v1118_v50 }
0x1e7c   :  { %1774 = vmatpush3.bf16.msra.mxu1 %v2212_v8  ;;  %1777 = vmatprep.mubr.msk.bf16.mxu1 %vm1992_vm1, %v1991_v1 }
0x1e7d   :  { %1775 = vmatprep.subr.bf16.mxu1 %v1991_v1 }
0x1e80   :  { %1776 = vmatpush3.bf16.msra.mxu1 %v2224_v53 }
0x1e81   :  { %1789 = vmatprep.subr.bf16.mxu1 %v1991_v1 }
0x1f4e   :  { %v1156_v51 = vpop.f32.mrb[24].mxu1 }
0x1f4f   :  { %v1163_v52 = vrot.slane %v1156_v51, 4  ;;  %v1763_v54 = vpop.f32.mrb[25].mxu1 }
0x1f50   :  { %v1159_v55 = vpop.f32.mrb[26].mxu1 }
0x1f51   :  { %v1165_v56 = vadd.f32 %v1163_v52, %v2260_v44  ;;  %v1764_v57 = vpop.f32.mrb[27].mxu1 }
0x1f53   :  { %v1166_v58 = vadd.f32 %v2256_v40, %v1165_v56 }
0x1f55   :  { %1903 = vtanh.f32 %v1166_v58  ;;  %v1591_v60 = vmul.f32 -1.442695, %v1166_v58 }
0x1f57   :  { %1905 = vpow2.f32 %v1591_v60 }
0x1f5f   :  { %v1904_v59 = vpop.eup %1903 }
0x1f60   :  { %1179 = vrot.lane.b32.xlu1 %v1904_v59, %s1994_s7 }
0x1f61   :  { %v1906_v61 = vpop.eup %1905 }
0x1f62   :  { %v1170_v62 = vadd.f32 1.0, %v1906_v61 }
0x1f64   :  { %1907 = vrcp.f32 %v1170_v62 }
0x1f6e   :  { %v1908_v63 = vpop.eup %1907 }
0x1f6f   :  { %v1177_v12 = vmul.f32 %v1908_v63, %v1175_v4 }
0x1fd2   :  { %v1180_v0 = vpop.permute.xlu1 %1179 }
0x1fd3   :  { %v1182_v3 = vmul.f32 %v1908_v63, %v1180_v0 }
0x1fd5   :  { %1184 = vrot.lane.b32.xlu0 %v1182_v3, %s1995_s8 }
0x2047   :  { %v1185_v44 = vpop.permute.xlu0 %1184 }
0x2048   :  { %v1187_v13 = vadd.f32 %v1185_v44, %v1177_v12 }
0x204a   :  { %1909 = vtanh.f32 %v1187_v13  ;;  %v1252_v27 = vrot.slane %v1187_v13, 4 }
0x2054   :  { %v1910_v14 = vpop.eup %1909 }
0x2055   :  { %1190 = vrot.lane.b32.xlu1 %v1910_v14, %s1994_s7 }
0x20c7   :  { %v1191_v15 = vpop.permute.xlu1 %1190 }
0x20c8   :  { %v1193_v16 = vmul.f32 %v1908_v63, %v1191_v15 }
0x20ca   :  { %v1194_v17 = vpack.c.bf16 %v1193_v16, %v1193_v16 }
0x20cc   :  { %v1196_v18 = vrot.slane %v1194_v17, 2 }
0x20ce   :  { %1197 = vrot.lane.b32.xlu0 %v1196_v18, %s1995_s8 }
0x2140   :  { %v1198_v9 = vpop.permute.xlu0 %1197 }
0x2141   :  { %1770 = vmatmul.mubr.msk.bf16.vlgmr.msra.gmra.mrb[28].mxu0 %vm120_vm2, %v1198_v9 }
0x2142   :  { %1782 = vmatpush3.bf16.msra.mxu0 %v2212_v8  ;;  %1785 = vmatprep.mubr.msk.bf16.mxu0 %vm1992_vm1, %v1991_v1 }
0x2143   :  { %1783 = vmatprep.subr.bf16.mxu0 %v1991_v1 }
0x2146   :  { %1784 = vmatpush3.bf16.msra.mxu0 %v2224_v53 }
0x2214   :  { %v1236_v11 = vpop.f32.mrb[28].mxu0 }
0x2215   :  { %v1242_v19 = vadd.f32 %v2251_v39, %v1236_v11  ;;  %v1771_v2 = vpop.f32.mrb[29].mxu0 }
0x2216   :  { %v1239_v22 = vpop.f32.mrb[30].mxu0 }
0x2217   :  { %v1243_v30 = vadd.f32 %v2256_v40, %v1242_v19  ;;  %v1772_v23 = vpop.f32.mrb[31].mxu0 }
0x2219   :  { %1911 = vtanh.f32 %v1243_v30  ;;  %v1593_v24 = vmul.f32 -1.442695, %v1243_v30 }
0x221b   :  { %1913 = vpow2.f32 %v1593_v24 }
0x2223   :  { %v1912_v20 = vpop.eup %1911 }
0x2224   :  { %1256 = vrot.lane.b32.xlu1 %v1912_v20, %s1994_s7 }
0x2225   :  { %v1914_v5 = vpop.eup %1913 }
0x2226   :  { %v1247_v43 = vadd.f32 1.0, %v1914_v5 }
0x2228   :  { %1915 = vrcp.f32 %v1247_v43 }
0x2232   :  { %v1916_v25 = vpop.eup %1915 }
0x2233   :  { %v1254_v28 = vmul.f32 %v1916_v25, %v1252_v27 }
0x2296   :  { %v1257_v26 = vpop.permute.xlu1 %1256 }
0x2297   :  { %v1259_v6 = vmul.f32 %v1916_v25, %v1257_v26 }
0x2299   :  { %1261 = vrot.lane.b32.xlu0 %v1259_v6, %s1995_s8 }
0x230b   :  { %v1262_v7 = vpop.permute.xlu0 %1261 }
0x230c   :  { %v1264_v29 = vadd.f32 %v1262_v7, %v1254_v28 }
0x230e   :  { %1917 = vtanh.f32 %v1264_v29  ;;  %v1331_v51 = vrot.slane %v1264_v29, 4 }
0x2318   :  { %v1918_v31 = vpop.eup %1917 }
0x2319   :  { %1267 = vrot.lane.b32.xlu1 %v1918_v31, %s1994_s7 }
0x238b   :  { %v1268_v32 = vpop.permute.xlu1 %1267 }
0x238c   :  { %v1270_v33 = vmul.f32 %v1916_v25, %v1268_v32 }
0x238e   :  { %v1271_v34 = vpack.c.bf16 %v1270_v33, %v1270_v33 }
0x2390   :  { %1273 = vrot.lane.b32.xlu0 %v1271_v34, %s1995_s8 }
0x2402   :  { %v1274_v35 = vpop.permute.xlu0 %1273 }
0x2403   :  { %1778 = vmatmul.mubr.msk.bf16.vlgmr.msra.gmra.mrb[28].mxu1 %vm120_vm2, %v1274_v35 }
0x2404   :  { %1790 = vmatpush3.bf16.msra.mxu1 %v2212_v8  ;;  %1793 = vmatprep.mubr.msk.bf16.mxu1 %vm1992_vm1, %v1991_v1 }
0x2405   :  { %1791 = vmatprep.subr.bf16.mxu1 %v1991_v1 }
0x2408   :  { %1792 = vmatpush3.bf16.msra.mxu1 %v2224_v53 }
0x24d6   :  { %v1312_v36 = vpop.f32.mrb[28].mxu1 }
0x24d7   :  { %v1319_v37 = vrot.slane %v1312_v36, 4  ;;  %v1779_v38 = vpop.f32.mrb[29].mxu1 }
0x24d8   :  { %v1315_v10 = vpop.f32.mrb[30].mxu1 }
0x24d9   :  { %v1321_v41 = vadd.f32 %v2251_v39, %v1319_v37  ;;  %v1780_v45 = vpop.f32.mrb[31].mxu1 }
0x24db   :  { %v1322_v46 = vadd.f32 %v2256_v40, %v1321_v41 }
0x24dd   :  { %1919 = vtanh.f32 %v1322_v46  ;;  %v1595_v8 = vmul.f32 -1.442695, %v1322_v46 }
0x24df   :  { %1921 = vpow2.f32 %v1595_v8 }
0x24e7   :  { %v1920_v47 = vpop.eup %1919 }
0x24e8   :  { %1335 = vrot.lane.b32.xlu1 %v1920_v47, %s1994_s7 }
0x24e9   :  { %v1922_v48 = vpop.eup %1921 }
0x24ea   :  { %v1326_v49 = vadd.f32 1.0, %v1922_v48 }
0x24ec   :  { %1923 = vrcp.f32 %v1326_v49 }
0x24f6   :  { %v1924_v1 = vpop.eup %1923 }
0x24f7   :  { %v1333_v52 = vmul.f32 %v1924_v1, %v1331_v51 }
0x255a   :  { %v1336_v53 = vpop.permute.xlu1 %1335 }
0x255b   :  { %v1338_v50 = vmul.f32 %v1924_v1, %v1336_v53 }
0x255d   :  { %1340 = vrot.lane.b32.xlu0 %v1338_v50, %s1995_s8 }
0x25cf   :  { %v1341_v39 = vpop.permute.xlu0 %1340 }
0x25d0   :  { %v1343_v54 = vadd.f32 %v1341_v39, %v1333_v52 }
0x25d2   :  { %1925 = vtanh.f32 %v1343_v54  ;;  %v1408_v18 = vrot.slane %v1343_v54, 4 }
0x25dc   :  { %v1926_v55 = vpop.eup %1925 }
0x25dd   :  { %1346 = vrot.lane.b32.xlu1 %v1926_v55, %s1994_s7 }
0x264f   :  { %v1347_v56 = vpop.permute.xlu1 %1346 }
0x2650   :  { %v1349_v57 = vmul.f32 %v1924_v1, %v1347_v56 }
0x2652   :  { %v1350_v58 = vpack.c.bf16 %v1349_v57, %v1349_v57 }
0x2654   :  { %v1352_v59 = vrot.slane %v1350_v58, 2 }
0x2656   :  { %1353 = vrot.lane.b32.xlu0 %v1352_v59, %s1995_s8 }
0x26c8   :  { %v1354_v60 = vpop.permute.xlu0 %1353 }
0x26c9   :  { %1786 = vmatmul.mubr.msk.bf16.vlgmr.msra.gmra.mrb[32].mxu0 %vm120_vm2, %v1354_v60 }
0x279c   :  { %v1392_v61 = vpop.f32.mrb[32].mxu0 }
0x279d   :  { %v1398_v62 = vadd.f32 %v2258_v42, %v1392_v61  ;;  %v1787_v63 = vpop.f32.mrb[33].mxu0 }
0x279e   :  { %v1395_v0 = vpop.f32.mrb[34].mxu0 }
0x279f   :  { %v1399_v3 = vadd.f32 %v2256_v40, %v1398_v62  ;;  %v1788_v4 = vpop.f32.mrb[35].mxu0 }
0x27a1   :  { %1927 = vtanh.f32 %v1399_v3  ;;  %v1597_v44 = vmul.f32 -1.442695, %v1399_v3 }
0x27a3   :  { %1929 = vpow2.f32 %v1597_v44 }
0x27ab   :  { %v1928_v12 = vpop.eup %1927 }
0x27ac   :  { %1412 = vrot.lane.b32.xlu1 %v1928_v12, %s1994_s7 }
0x27ad   :  { %v1930_v13 = vpop.eup %1929 }
0x27ae   :  { %v1403_v14 = vadd.f32 1.0, %v1930_v13 }
0x27b0   :  { %1931 = vrcp.f32 %v1403_v14 }
0x27ba   :  { %v1932_v15 = vpop.eup %1931 }
0x27bb   :  { %v1410_v9 = vmul.f32 %v1932_v15, %v1408_v18 }
0x281e   :  { %v1413_v16 = vpop.permute.xlu1 %1412 }
0x281f   :  { %v1415_v17 = vmul.f32 %v1932_v15, %v1413_v16 }
0x2821   :  { %1417 = vrot.lane.b32.xlu0 %v1415_v17, %s1995_s8 }
0x2893   :  { %v1418_v11 = vpop.permute.xlu0 %1417 }
0x2894   :  { %v1420_v19 = vadd.f32 %v1418_v11, %v1410_v9 }
0x2896   :  { %1933 = vtanh.f32 %v1420_v19 }
0x28a0   :  { %v1934_v2 = vpop.eup %1933 }
0x28a1   :  { %1423 = vrot.lane.b32.xlu1 %v1934_v2, %s1994_s7 }
0x2913   :  { %v1424_v22 = vpop.permute.xlu1 %1423 }
0x2914   :  { %v1426_v30 = vmul.f32 %v1932_v15, %v1424_v22 }
0x2916   :  { %v1427_v23 = vpack.c.bf16 %v1426_v30, %v1426_v30 }
0x2918   :  { %1429 = vrot.lane.b32.xlu0 %v1427_v23, %s1995_s8 }
0x298a   :  { %v1430_v20 = vpop.permute.xlu0 %1429 }
0x298b   :  { %1794 = vmatmul.mubr.msk.bf16.vlgmr.msra.gmra.mrb[32].mxu1 %vm120_vm2, %v1430_v20 }
0x2a5e   :  { %v1468_v24 = vpop.f32.mrb[32].mxu1 }
0x2a5f   :  { %v1475_v5 = vrot.slane %v1468_v24, 4  ;;  %v1795_v43 = vpop.f32.mrb[33].mxu1 }
0x2a60   :  { %v1471_v25 = vpop.f32.mrb[34].mxu1 }
0x2a61   :  { %v1477_v26 = vadd.f32 %v2258_v42, %v1475_v5  ;;  %v1796_v6 = vpop.f32.mrb[35].mxu1  ;;  %v1487_v42 = vrot.slane %v1420_v19, 4 }
0x2a63   :  { %v1478_v27 = vadd.f32 %v2256_v40, %v1477_v26 }
0x2a65   :  { %1935 = vtanh.f32 %v1478_v27  ;;  %v1599_v7 = vmul.f32 -1.442695, %v1478_v27 }
0x2a67   :  { %1937 = vpow2.f32 %v1599_v7 }
0x2a6f   :  { %v1936_v28 = vpop.eup %1935 }
0x2a70   :  { %1491 = vrot.lane.b32.xlu1 %v1936_v28, %s1994_s7 }
0x2a71   :  { %v1938_v29 = vpop.eup %1937 }
0x2a72   :  { %v1482_v31 = vadd.f32 1.0, %v1938_v29 }
0x2a74   :  { %1939 = vrcp.f32 %v1482_v31 }
0x2a7e   :  { %v1940_v32 = vpop.eup %1939 }
0x2a7f   :  { %v1489_v35 = vmul.f32 %v1940_v32, %v1487_v42 }
0x2ae2   :  { %v1492_v33 = vpop.permute.xlu1 %1491 }
0x2ae3   :  { %v1494_v34 = vmul.f32 %v1940_v32, %v1492_v33 }
0x2ae5   :  { %1496 = vrot.lane.b32.xlu0 %v1494_v34, %s1995_s8 }
0x2ae9   :  { %787 = vrot.lane.b32.xlu0 %v2199_v21, %s1996_s4 }
0x2b57   :  { %v1497_v40 = vpop.permute.xlu0 %1496 }
0x2b58   :  { %v1499_v36 = vadd.f32 %v1497_v40, %v1489_v35 }
0x2b5a   :  { %1941 = vtanh.f32 %v1499_v36  ;;  %1513 = vrot.lane.b32.xlu0 %v1499_v36, %s1996_s4 }
0x2b5b   :  { %v788_v37 = vpop.permute.xlu0 %787 }
0x2b5c   :  { %790 = vst.msk [vmem:[#allocation5 - $0x4] sm:$0xf0] %vm285_vm4, %v788_v37 }
0x2b64   :  { %v1942_v38 = vpop.eup %1941 }
0x2b65   :  { %1502 = vrot.lane.b32.xlu1 %v1942_v38, %s1994_s7 }
0x2bcc   :  { %v1514_v10 = vpop.permute.xlu0 %1513 }
0x2bcd   :  { %1517 = vst.msk [vmem:[#allocation5] sm:$0xf0] %vm285_vm4, %v1514_v10 }
0x2bce   :  { %1954 = shalt.err (!%p1951_p4)
}
0x2bcf   :  { %s1955_s22 = scalar_lea.hbm %s2381_s6, 128 }
0x2bd0   :  { %p1956_p5 = scmp.ne.s32.totalorder %s2381_s6, %s1955_s22  ;;  %p1959_p6 = scmp.lt.u32.totalorder %s1955_s22, %s2381_s6 }
0x2bd2   :  { %p1961_p7 = pnand %p1959_p6, %p1956_p5 }
0x2bd4   :  { %1964 = shalt.err (!%p1961_p7)
}
0x2bd5   :  { %s1998_s27 = smov 4   ;;  %s1999_s29 = smov [#allocation3]  }
0x2bd6   :  { %1541 = dma.vmem_to_hbm [thread:$0]  %s1536_s18, 128, %s2381_s6, [#allocation6], %s1994_s7, %s1994_s7, %s1998_s27  }
0x2bd7   :  { %v1503_v21 = vpop.permute.xlu1 %1502  ;;  %s1523_s0 = sshll.u32 %s1999_s29, 4  ;;  %s1524_s0 = int_to_ptr.vmem [resolvable:$true] %s1523_s0 }
0x2bd8   :  { %v1505_v41 = vmul.f32 %v1940_v32, %v1503_v21  ;;  %s1965_s30 = scalar_lea.vmem %s1524_s0, 128  ;;  %p1970_p9 = scmp.lt.s32.totalorder %s1524_s0, %s1524_s0 }
0x2bd9   :  { %p1966_p8 = scmp.ne.s32.totalorder %s1524_s0, %s1965_s30  ;;  %p1971_p10 = scmp.lt.s32.totalorder %s1965_s30, %s1965_s30 }
0x2bda   :  { %1507 = vrot.lane.b32.xlu1 %v1505_v41, %s1995_s8 }
0x2bdb   :  { %p1972_p11 = por %p1971_p10, %p1970_p9 }
0x2bdd   :  { %p1973_p12 = pnand %p1972_p11, %p1966_p8 }
0x2c4c   :  { %v1508_v45 = vpop.permute.xlu1 %1507 }
0x2c4d   :  { %1511 = vst.msk [vmem:[#allocation3] sm:$0xf0] %vm285_vm4, %v1508_v45 }
0x2c4e   :  { %1976 = shalt.err (!%p1973_p12)
}
0x2c4f   :  { %s1977_s6 = scalar_lea.hbm %s2380_s5, 128 }
0x2c50   :  { %p1978_p13 = scmp.ne.s32.totalorder %s2380_s5, %s1977_s6  ;;  %p1981_p0 = scmp.lt.u32.totalorder %s1977_s6, %s2380_s5 }
0x2c52   :  { %p1983_p1 = pnand %p1981_p0, %p1978_p13 }
0x2c54   :  { %1986 = shalt.err (!%p1983_p1)
}
0x2c55   :  { %1529 = dma.vmem_to_hbm [thread:$0]  %s1524_s0, 128, %s2380_s5, [#allocation4], %s1994_s7, %s1994_s7, %s1998_s27  }
0x2c56   :  { %1987 = dma.done.wait [#allocation4], 128  }
0x2c57   :  { %1988 = vsyncadd [#allocation4], 4294967168 }
0x2c58   :  { %1989 = dma.done.wait [#allocation6], 128  }
0x2c59   :  { %1990 = vsyncadd [#allocation6], 4294967168 }
0x2c5a   :  { %1548 = vsyncpa [#allocation4], 1 }
0x2c5b   :  { %1549 = vsyncpa [#allocation6], 1 }

</bundles_post_ra>
